<compile_context>
chip_gen: v6e
topology: v6e:2x2x1
jax: 0.10.0
libtpu: 0.0.40
codegen_flags: <defaults>
</compile_context>

<pallas_src>
import functools

import jax
import jax.numpy as jnp
from jax.experimental import pallas as pl
from jax.experimental.pallas import tpu as pltpu

_LEAKY_SLOPE = 0.2


def lin_decoder_kernel(x_ref, w1_ref, b1_ref, w2_ref, b2_ref, o_ref):
    # ---- layer 1: (TB, L) @ (L, H) on the MXU; operands in the weight dtype
    # (bf16 by default -> full-rate MXU), f32 accumulation.
    x = x_ref[...].astype(w1_ref.dtype)
    h = jnp.dot(x, w1_ref[...], preferred_element_type=jnp.float32)
    h = h + b1_ref[...]                       # (TB, H) + (1, H) broadcast, f32
    h = jnp.maximum(h, _LEAKY_SLOPE * h)      # LeakyReLU(0.2): single VALU max
    # ---- layer 2: (TB, H) @ (H, D); cast only at the MXU input.
    y = jnp.dot(h.astype(w2_ref.dtype), w2_ref[...],
                preferred_element_type=jnp.float32)
    y = y + b2_ref[...]                       # (TB, D) + (1, D) broadcast, f32
    o_ref[...] = y.astype(o_ref.dtype)


def _round_up(n, m):
    return ((n + m - 1) // m) * m


def _tpu_generation():
    try:
        kind = jax.devices()[0].device_kind.lower()
    except Exception:
        return "unknown"
    if "v7" in kind or "7x" in kind:
        return "v7x"
    if "v6" in kind:
        return "v6e"
    if "v5" in kind:
        return "v5e"
    return "unknown"


def _resident_spec(shape):
    """BlockSpec for an operand that is identical for every grid step.

    Requests a single VMEM buffer (it is DMA'd once); falls back to the default
    double-buffered spec on jax versions without pipeline_mode/Buffered.
    """
    try:
        return pl.BlockSpec(shape, lambda i: (0, 0), pipeline_mode=pl.Buffered(1))
    except Exception:
        return pl.BlockSpec(shape, lambda i: (0, 0))


@functools.partial(
    jax.jit, static_argnames=("block_b", "vmem_limit_bytes", "use_bf16_mxu"))
def lin_decoder(x, w1, b1, w2, b2, *, block_b=None, vmem_limit_bytes=None,
                use_bf16_mxu=True):
    B, L = x.shape
    L_w, H = w1.shape
    H_w, D = w2.shape
    assert L == L_w and H == H_w
    assert b1.shape == (1, H) and b2.shape == (1, D)

    gen = _tpu_generation()
    # Generation-specific defaults: v5e/v6e have 128 MiB physical VMEM so the
    # batch tile and scoped-VMEM limit can be large; v7x only has 64 MiB.
    if vmem_limit_bytes is None:
        vmem_limit_bytes = {"v5e": 64 << 20, "v6e": 64 << 20,
                            "v7x": 32 << 20}.get(gen, 32 << 20)
    if block_b is None:
        block_b = {"v5e": 2048, "v6e": 2048, "v7x": 1024}.get(gen, 512)

    # Mixed precision: bf16 operands into the MXU, f32 accumulation.  The f32
    # MXU path is multi-pass emulation (~4-8x below bf16 peak), so this is the
    # dominant lever for this compute-bound kernel.  Biases stay f32 (the bias
    # add + activation run in f32 on the VPU).
    w_dtype = jnp.bfloat16 if use_bf16_mxu else w1.dtype
    w1 = w1.astype(w_dtype)
    w2 = w2.astype(w_dtype)
    b1 = b1.astype(jnp.float32)
    b2 = b2.astype(jnp.float32)

    # --- Lane-dense padding of all feature dims (all exact):
    #   L -> mult of 128: padded x columns hit zero rows of w1 (contribute 0).
    #   H -> mult of 128: padded hidden columns hit zero rows of w2.
    #   D -> mult of 128: padded output columns are sliced off below; avoids
    #        masked partial stores / ragged output DMAs (stores dominate the
    #        streamed HBM bytes of this kernel).
    Lp, Hp, Dp = _round_up(L, 128), _round_up(H, 128), _round_up(D, 128)
    if Lp != L:
        x = jnp.pad(x, ((0, 0), (0, Lp - L)))
        w1 = jnp.pad(w1, ((0, Lp - L), (0, 0)))
    if Hp != H:
        w1 = jnp.pad(w1, ((0, 0), (0, Hp - H)))
        b1 = jnp.pad(b1, ((0, 0), (0, Hp - H)))
        w2 = jnp.pad(w2, ((0, Hp - H), (0, 0)))
    if Dp != D:
        w2 = jnp.pad(w2, ((0, 0), (0, Dp - D)))
        b2 = jnp.pad(b2, ((0, 0), (0, Dp - D)))

    x_bytes = jnp.dtype(x.dtype).itemsize
    w_bytes = jnp.dtype(w_dtype).itemsize
    out_bytes = x_bytes

    # Sublane granularity for the batch tile: 8 rows (f32), 16 (bf16).
    sub = 8 * max(1, 4 // min(x_bytes, out_bytes))

    # --- VMEM footprint model (honest: includes the f32 hidden, the f32 y temp
    # before the output cast, and the bf16 MXU-input temporaries).
    # Weights/biases use constant index_maps + single buffering -> one copy.
    weight_resident = (Lp * Hp + Hp * Dp) * w_bytes + (Hp + Dp) * 4
    budget = int(0.70 * vmem_limit_bytes)

    def tile_footprint(tb):
        io = 2 * tb * Lp * x_bytes + 2 * tb * Dp * out_bytes   # dbl-buffered x / out
        f32_tmps = tb * Hp * 4 + tb * Dp * 4                   # f32 hidden + f32 y
        mxu_tmps = tb * (Lp + Hp) * w_bytes                    # casted MXU inputs
        return io + f32_tmps + mxu_tmps

    TB = max(sub, min(_round_up(block_b, sub), _round_up(B, sub)))
    while TB > sub and weight_resident + tile_footprint(TB) > budget:
        TB = max(sub, _round_up(TB // 2, sub))

    n_tiles = pl.cdiv(B, TB)

    # Megacore: on v7x (2 TensorCores/chip) plain "parallel" does not shard the
    # grid across cores -- CORE_PARALLEL does.  Keep the tile count even so both
    # cores get work.  v5e/v6e are single-TC: keep the plain parallel semantics.
    if gen == "v7x" and n_tiles > 1:
        n_tiles = _round_up(n_tiles, 2)
        batch_semantics = getattr(pltpu, "CORE_PARALLEL", "parallel")
    else:
        batch_semantics = "parallel"

    # --- Pad the batch to a whole number of tiles (zero rows, sliced off below).
    Bp = n_tiles * TB
    if Bp != B:
        x = jnp.pad(x, ((0, Bp - B), (0, 0)))

    out = pl.pallas_call(
        lin_decoder_kernel,
        out_shape=jax.ShapeDtypeStruct((Bp, Dp), x.dtype),
        grid=(n_tiles,),
        in_specs=[
            pl.BlockSpec((TB, Lp), lambda i: (i, 0)),   # streamed per batch tile
            _resident_spec((Lp, Hp)),                   # weights: VMEM-resident
            _resident_spec((1, Hp)),
            _resident_spec((Hp, Dp)),
            _resident_spec((1, Dp)),
        ],
        out_specs=pl.BlockSpec((TB, Dp), lambda i: (i, 0)),
        compiler_params=pltpu.CompilerParams(
            dimension_semantics=(batch_semantics,),
            vmem_limit_bytes=vmem_limit_bytes,
        ),
    )(x, w1, b1, w2, b2)

    out = out[:B] if Bp != B else out
    return out[:, :D] if Dp != D else out


def init_linear_params(key, fan_in, fan_out, dtype=jnp.float32):
    # Mimics torch.nn.Linear default init: U(-1/sqrt(fan_in), +1/sqrt(fan_in)).
    kw, kb = jax.random.split(key)
    bound = 1.0 / (fan_in ** 0.5)
    w = jax.random.uniform(kw, (fan_in, fan_out), dtype, minval=-bound, maxval=bound)
    b = jax.random.uniform(kb, (1, fan_out), dtype, minval=-bound, maxval=bound)
    return w, b


if __name__ == "__main__":
    # Module default sizes: latent=200 -> hidden=400 -> input=784.
    INPUT, HIDDEN, LATENT = 784, 400, 200
    B_SMALL = 8

    key = jax.random.PRNGKey(0)
    kx, k1, k2, kx2 = jax.random.split(key, 4)

    x = jax.random.normal(kx, (B_SMALL, LATENT), jnp.float32)
    w1, b1 = init_linear_params(k1, LATENT, HIDDEN)
    w2, b2 = init_linear_params(k2, HIDDEN, INPUT)

    def ref_fn(xx, mxu_dtype):
        # Same math as the module (with the same MXU-input dtype as the kernel).
        h = jnp.dot(xx.astype(mxu_dtype), w1.astype(mxu_dtype),
                    preferred_element_type=jnp.float32) + b1
        h = jnp.maximum(h, _LEAKY_SLOPE * h)   # LeakyReLU(0.2) assumed (see TODO)
        return jnp.dot(h.astype(mxu_dtype), w2.astype(mxu_dtype),
                       preferred_element_type=jnp.float32) + b2

    # 1) f32 MXU path vs pure-f32 reference (exact module semantics).
    out_f32 = jax.block_until_ready(
        lin_decoder(x, w1, b1, w2, b2, use_bf16_mxu=False))
    assert out_f32.shape == (B_SMALL, INPUT)
    assert jnp.allclose(out_f32, ref_fn(x, jnp.float32), atol=1e-4, rtol=1e-4), \
        "mismatch (f32 path)"

    # 2) Default bf16-MXU path (mixed precision) vs a bf16-input reference.
    out_bf16 = jax.block_until_ready(lin_decoder(x, w1, b1, w2, b2))
    assert out_bf16.shape == (B_SMALL, INPUT)
    assert jnp.allclose(out_bf16, ref_fn(x, jnp.bfloat16), atol=2e-2, rtol=2e-2), \
        "mismatch (bf16 path)"

    # 3) Multi-tile, ragged-batch check: exercises the pipelined path + batch
    #    padding + output-dim padding/slicing.
    B_BIG = 1037
    x_big = jax.random.normal(kx2, (B_BIG, LATENT), jnp.float32)
    out_big = jax.block_until_ready(
        lin_decoder(x_big, w1, b1, w2, b2, block_b=512))
    assert out_big.shape == (B_BIG, INPUT)
    assert jnp.allclose(out_big, ref_fn(x_big, jnp.bfloat16), atol=2e-2, rtol=2e-2), \
        "mismatch (big)"

    print("KERNEL_OK")
</pallas_src>

<mosaic_0001>
module attributes {stable_mosaic.version = 11 : i64} {
  func.func @lin_decoder_kernel(%arg0: i32, %arg1: memref<8x256xf32, #tpu.memory_space<vmem>>, %arg2: memref<256x512xf32, #tpu.memory_space<vmem>>, %arg3: memref<1x512xf32, #tpu.memory_space<vmem>>, %arg4: memref<512x896xf32, #tpu.memory_space<vmem>>, %arg5: memref<1x896xf32, #tpu.memory_space<vmem>>, %arg6: memref<8x896xf32, #tpu.memory_space<vmem>>) attributes {dimension_semantics = [#tpu.dimension_semantics<parallel>], iteration_bounds = array<i64: 1>, scalar_prefetch = 0 : i64, scratch_operands = 0 : i64, tpu.core_type = #tpu.core_type<tc>, window_params = [{transform_indices = @transform_0, window_bounds = array<i64: 8, 256>}, {pipeline_mode = #tpu.pipeline_mode<synchronous>, transform_indices = @transform_1, window_bounds = array<i64: 256, 512>}, {pipeline_mode = #tpu.pipeline_mode<synchronous>, transform_indices = @transform_2, window_bounds = array<i64: 1, 512>}, {pipeline_mode = #tpu.pipeline_mode<synchronous>, transform_indices = @transform_3, window_bounds = array<i64: 512, 896>}, {pipeline_mode = #tpu.pipeline_mode<synchronous>, transform_indices = @transform_4, window_bounds = array<i64: 1, 896>}, {transform_indices = @transform_5, window_bounds = array<i64: 8, 896>}]} {
    %c0 = arith.constant 0 : index
    %c0_0 = arith.constant 0 : index
    %0 = vector.load %arg1[%c0, %c0_0] : memref<8x256xf32, #tpu.memory_space<vmem>>, vector<8x256xf32>
    %c0_1 = arith.constant 0 : index
    %c0_2 = arith.constant 0 : index
    %1 = vector.load %arg2[%c0_1, %c0_2] : memref<256x512xf32, #tpu.memory_space<vmem>>, vector<256x512xf32>
    %cst = arith.constant dense<0.000000e+00> : vector<8x512xf32>
    %2 = tpu.matmul %0, %1, %cst {dimension_numbers = #tpu.dot_dimension_numbers<[1], [0], [0], [1], [0, 0, 1, 1], [], []>} : vector<8x256xf32>, vector<256x512xf32>, vector<8x512xf32> -> vector<8x512xf32>
    %c0_3 = arith.constant 0 : index
    %c0_4 = arith.constant 0 : index
    %3 = vector.load %arg3[%c0_3, %c0_4] : memref<1x512xf32, #tpu.memory_space<vmem>>, vector<1x512xf32>
    %4 = vector.broadcast %3 : vector<1x512xf32> to vector<8x512xf32>
    %5 = arith.addf %2, %4 : vector<8x512xf32>
    %cst_5 = arith.constant 2.000000e-01 : f32
    %6 = vector.broadcast %cst_5 : f32 to vector<8x512xf32>
    %7 = arith.mulf %6, %5 : vector<8x512xf32>
    %8 = arith.maximumf %5, %7 : vector<8x512xf32>
    %c0_6 = arith.constant 0 : index
    %c0_7 = arith.constant 0 : index
    %9 = vector.load %arg4[%c0_6, %c0_7] : memref<512x896xf32, #tpu.memory_space<vmem>>, vector<512x896xf32>
    %cst_8 = arith.constant dense<0.000000e+00> : vector<8x896xf32>
    %10 = tpu.matmul %8, %9, %cst_8 {dimension_numbers = #tpu.dot_dimension_numbers<[1], [0], [0], [1], [0, 0, 1, 1], [], []>} : vector<8x512xf32>, vector<512x896xf32>, vector<8x896xf32> -> vector<8x896xf32>
    %c0_9 = arith.constant 0 : index
    %c0_10 = arith.constant 0 : index
    %11 = vector.load %arg5[%c0_9, %c0_10] : memref<1x896xf32, #tpu.memory_space<vmem>>, vector<1x896xf32>
    %12 = vector.broadcast %11 : vector<1x896xf32> to vector<8x896xf32>
    %13 = arith.addf %10, %12 : vector<8x896xf32>
    %c0_11 = arith.constant 0 : index
    %c0_12 = arith.constant 0 : index
    %14 = vector.load %arg6[%c0_11, %c0_12] : memref<8x896xf32, #tpu.memory_space<vmem>>, vector<8x896xf32>
    tpu.vector_store %arg6[%c0_11, %c0_12], %13 {strides = array<i32>} : memref<8x896xf32, #tpu.memory_space<vmem>>, vector<8x896xf32>,
    return
  }
  func.func @transform_0(%arg0: i32) -> (i32, i32) {
    %c0_i32 = arith.constant 0 : i32
    %c0_i32_0 = arith.constant 0 : i32
    return %arg0, %c0_i32 : i32, i32
  }
  func.func @transform_1(%arg0: i32) -> (i32, i32) {
    %c0_i32 = arith.constant 0 : i32
    %c0_i32_0 = arith.constant 0 : i32
    %c0_i32_1 = arith.constant 0 : i32
    return %c0_i32, %c0_i32_0 : i32, i32
  }
  func.func @transform_2(%arg0: i32) -> (i32, i32) {
    %c0_i32 = arith.constant 0 : i32
    %c0_i32_0 = arith.constant 0 : i32
    %c0_i32_1 = arith.constant 0 : i32
    return %c0_i32, %c0_i32_0 : i32, i32
  }
  func.func @transform_3(%arg0: i32) -> (i32, i32) {
    %c0_i32 = arith.constant 0 : i32
    %c0_i32_0 = arith.constant 0 : i32
    %c0_i32_1 = arith.constant 0 : i32
    return %c0_i32, %c0_i32_0 : i32, i32
  }
  func.func @transform_4(%arg0: i32) -> (i32, i32) {
    %c0_i32 = arith.constant 0 : i32
    %c0_i32_0 = arith.constant 0 : i32
    %c0_i32_1 = arith.constant 0 : i32
    return %c0_i32, %c0_i32_0 : i32, i32
  }
  func.func @transform_5(%arg0: i32) -> (i32, i32) {
    %c0_i32 = arith.constant 0 : i32
    %c0_i32_0 = arith.constant 0 : i32
    return %arg0, %c0_i32 : i32, i32
  }
}

</mosaic_0001>

<bundles_post_ra>
// kernel: lin_decoder.1
= control target key start
LH: loop header
LB: loop body
LE: loop exit
PB: predicated region body
PF: predicated region fallthrough
CT: control target
= control target key end

     0   :  { %s3311_s0 = inlined_call_operand.vmem [shape: f32[8,256], index: 0, kind: input, shape index: {}]   ;;  %s3312_s1 = inlined_call_operand.vmem [shape: f32[256,512], index: 1, kind: input, shape index: {}]   ;;  %s3313_s2 = inlined_call_operand.vmem [shape: f32[1,512], index: 2, kind: input, shape index: {}]   ;;  %s3314_s3 = inlined_call_operand.vmem [shape: f32[512,896], index: 3, kind: input, shape index: {}]   ;;  %s3315_s4 = inlined_call_operand.vmem [shape: f32[1,896], index: 4, kind: input, shape index: {}]   ;;  %s3316_s5 = inlined_call_operand.hbm [shape: f32[8,896], index: 5, kind: output, shape index: {}]  }
   0x1   :  { %v84_v0 = vld [vmem:[%s3312_s1 + $0x1e8] sm:$0xff]  ;;  %v86_v1 = vld [vmem:[%s3312_s1 + $0x1f8] sm:$0xff]  ;;  %v83_v2 = vld [vmem:[%s3312_s1 + $0x1e0] sm:$0xff] }
   0x2   :  { %173 = vmatprep.subr.mxu0 %v84_v0  ;;  %244 = vmatprep.subr.mxu1 %v86_v1  ;;  %v85_v3 = vld [vmem:[%s3312_s1 + $0x1f0] sm:$0xff]  ;;  %v80_v4 = vld [vmem:[%s3312_s1 + $0x1c8] sm:$0xff]  ;;  %v82_v5 = vld [vmem:[%s3312_s1 + $0x1d8] sm:$0xff] }
   0x3   :  { %174 = vmatpush1.msra.mxu0 %v83_v2  ;;  %245 = vmatpush1.msra.mxu1 %v85_v3  ;;  %v79_v6 = vld [vmem:[%s3312_s1 + $0x1c0] sm:$0xff]  ;;  %v81_v7 = vld [vmem:[%s3312_s1 + $0x1d0] sm:$0xff]  ;;  %v76_v8 = vld [vmem:[%s3312_s1 + $0x1a8] sm:$0xff] }
   0x4   :  { %175 = vmatprep.subr.mxu0 %v80_v4  ;;  %246 = vmatprep.subr.mxu1 %v82_v5  ;;  %v78_v9 = vld [vmem:[%s3312_s1 + $0x1b8] sm:$0xff]  ;;  %v75_v10 = vld [vmem:[%s3312_s1 + $0x1a0] sm:$0xff]  ;;  %v77_v11 = vld [vmem:[%s3312_s1 + $0x1b0] sm:$0xff] }
   0x5   :  { %176 = vmatpush1.msra.mxu0 %v79_v6  ;;  %247 = vmatpush1.msra.mxu1 %v81_v7  ;;  %v72_v12 = vld [vmem:[%s3312_s1 + $0x188] sm:$0xff]  ;;  %v74_v13 = vld [vmem:[%s3312_s1 + $0x198] sm:$0xff]  ;;  %v71_v14 = vld [vmem:[%s3312_s1 + $0x180] sm:$0xff] }
   0x6   :  { %177 = vmatprep.subr.mxu0 %v76_v8  ;;  %248 = vmatprep.subr.mxu1 %v78_v9  ;;  %v73_v15 = vld [vmem:[%s3312_s1 + $0x190] sm:$0xff]  ;;  %v68_v16 = vld [vmem:[%s3312_s1 + $0x168] sm:$0xff]  ;;  %v70_v17 = vld [vmem:[%s3312_s1 + $0x178] sm:$0xff] }
   0x7   :  { %178 = vmatpush1.msra.mxu0 %v75_v10  ;;  %249 = vmatpush1.msra.mxu1 %v77_v11  ;;  %v67_v18 = vld [vmem:[%s3312_s1 + $0x160] sm:$0xff]  ;;  %v69_v19 = vld [vmem:[%s3312_s1 + $0x170] sm:$0xff]  ;;  %v64_v20 = vld [vmem:[%s3312_s1 + $0x148] sm:$0xff] }
   0x8   :  { %179 = vmatprep.subr.mxu0 %v72_v12  ;;  %250 = vmatprep.subr.mxu1 %v74_v13  ;;  %v66_v21 = vld [vmem:[%s3312_s1 + $0x158] sm:$0xff]  ;;  %v63_v22 = vld [vmem:[%s3312_s1 + $0x140] sm:$0xff]  ;;  %v65_v23 = vld [vmem:[%s3312_s1 + $0x150] sm:$0xff] }
   0x9   :  { %180 = vmatpush1.msra.mxu0 %v71_v14  ;;  %251 = vmatpush1.msra.mxu1 %v73_v15  ;;  %v60_v24 = vld [vmem:[%s3312_s1 + $0x128] sm:$0xff]  ;;  %v62_v25 = vld [vmem:[%s3312_s1 + $0x138] sm:$0xff]  ;;  %v59_v26 = vld [vmem:[%s3312_s1 + $0x120] sm:$0xff] }
   0xa   :  { %181 = vmatprep.subr.mxu0 %v68_v16  ;;  %252 = vmatprep.subr.mxu1 %v70_v17  ;;  %v61_v27 = vld [vmem:[%s3312_s1 + $0x130] sm:$0xff]  ;;  %v56_v28 = vld [vmem:[%s3312_s1 + $0x108] sm:$0xff]  ;;  %v58_v29 = vld [vmem:[%s3312_s1 + $0x118] sm:$0xff] }
   0xb   :  { %182 = vmatpush1.msra.mxu0 %v67_v18  ;;  %253 = vmatpush1.msra.mxu1 %v69_v19  ;;  %v55_v30 = vld [vmem:[%s3312_s1 + $0x100] sm:$0xff]  ;;  %v57_v31 = vld [vmem:[%s3312_s1 + $0x110] sm:$0xff]  ;;  %v52_v32 = vld [vmem:[%s3312_s1 + $0xe8] sm:$0xff] }
   0xc   :  { %183 = vmatprep.subr.mxu0 %v64_v20  ;;  %254 = vmatprep.subr.mxu1 %v66_v21  ;;  %v54_v33 = vld [vmem:[%s3312_s1 + $0xf8] sm:$0xff]  ;;  %v51_v34 = vld [vmem:[%s3312_s1 + $0xe0] sm:$0xff]  ;;  %v53_v35 = vld [vmem:[%s3312_s1 + $0xf0] sm:$0xff] }
   0xd   :  { %184 = vmatpush1.msra.mxu0 %v63_v22  ;;  %255 = vmatpush1.msra.mxu1 %v65_v23  ;;  %v48_v36 = vld [vmem:[%s3312_s1 + $0xc8] sm:$0xff]  ;;  %v50_v37 = vld [vmem:[%s3312_s1 + $0xd8] sm:$0xff]  ;;  %v47_v38 = vld [vmem:[%s3312_s1 + $0xc0] sm:$0xff] }
   0xe   :  { %185 = vmatprep.subr.mxu0 %v60_v24  ;;  %256 = vmatprep.subr.mxu1 %v62_v25  ;;  %v49_v39 = vld [vmem:[%s3312_s1 + $0xd0] sm:$0xff]  ;;  %v44_v40 = vld [vmem:[%s3312_s1 + $0xa8] sm:$0xff]  ;;  %v46_v41 = vld [vmem:[%s3312_s1 + $0xb8] sm:$0xff] }
   0xf   :  { %186 = vmatpush1.msra.mxu0 %v59_v26  ;;  %257 = vmatpush1.msra.mxu1 %v61_v27  ;;  %v43_v42 = vld [vmem:[%s3312_s1 + $0xa0] sm:$0xff]  ;;  %v45_v43 = vld [vmem:[%s3312_s1 + $0xb0] sm:$0xff]  ;;  %v40_v44 = vld [vmem:[%s3312_s1 + $0x88] sm:$0xff] }
  0x10   :  { %187 = vmatprep.subr.mxu0 %v56_v28  ;;  %258 = vmatprep.subr.mxu1 %v58_v29  ;;  %v42_v45 = vld [vmem:[%s3312_s1 + $0x98] sm:$0xff]  ;;  %v39_v46 = vld [vmem:[%s3312_s1 + $0x80] sm:$0xff]  ;;  %v41_v47 = vld [vmem:[%s3312_s1 + $0x90] sm:$0xff] }
  0x11   :  { %188 = vmatpush1.msra.mxu0 %v55_v30  ;;  %259 = vmatpush1.msra.mxu1 %v57_v31  ;;  %v36_v48 = vld [vmem:[%s3312_s1 + $0x68] sm:$0xff]  ;;  %v38_v49 = vld [vmem:[%s3312_s1 + $0x78] sm:$0xff]  ;;  %v35_v50 = vld [vmem:[%s3312_s1 + $0x60] sm:$0xff] }
  0x12   :  { %189 = vmatprep.subr.mxu0 %v52_v32  ;;  %260 = vmatprep.subr.mxu1 %v54_v33  ;;  %v37_v51 = vld [vmem:[%s3312_s1 + $0x70] sm:$0xff]  ;;  %v32_v52 = vld [vmem:[%s3312_s1 + $0x48] sm:$0xff]  ;;  %v34_v53 = vld [vmem:[%s3312_s1 + $0x58] sm:$0xff] }
  0x13   :  { %190 = vmatpush1.msra.mxu0 %v51_v34  ;;  %261 = vmatpush1.msra.mxu1 %v53_v35  ;;  %v31_v54 = vld [vmem:[%s3312_s1 + $0x40] sm:$0xff]  ;;  %v33_v55 = vld [vmem:[%s3312_s1 + $0x50] sm:$0xff]  ;;  %v28_v56 = vld [vmem:[%s3312_s1 + $0x28] sm:$0xff] }
  0x14   :  { %191 = vmatprep.subr.mxu0 %v48_v36  ;;  %262 = vmatprep.subr.mxu1 %v50_v37  ;;  %v30_v57 = vld [vmem:[%s3312_s1 + $0x38] sm:$0xff]  ;;  %v27_v58 = vld [vmem:[%s3312_s1 + $0x20] sm:$0xff]  ;;  %v29_v59 = vld [vmem:[%s3312_s1 + $0x30] sm:$0xff] }
  0x15   :  { %192 = vmatpush1.msra.mxu0 %v47_v38  ;;  %263 = vmatpush1.msra.mxu1 %v49_v39  ;;  %v24_v60 = vld [vmem:[%s3312_s1 + $0x8] sm:$0xff]  ;;  %v26_v61 = vld [vmem:[%s3312_s1 + $0x18] sm:$0xff]  ;;  %v23_v62 = vld [vmem:[%s3312_s1] sm:$0xff] }
  0x16   :  { %193 = vmatprep.subr.mxu0 %v44_v40  ;;  %264 = vmatprep.subr.mxu1 %v46_v41  ;;  %v25_v63 = vld [vmem:[%s3312_s1 + $0x10] sm:$0xff]  ;;  %v148_v0 = vld [vmem:[%s3312_s1 + $0x3e8] sm:$0xff]  ;;  %v150_v1 = vld [vmem:[%s3312_s1 + $0x3f8] sm:$0xff] }
  0x17   :  { %194 = vmatpush1.msra.mxu0 %v43_v42  ;;  %265 = vmatpush1.msra.mxu1 %v45_v43  ;;  %v147_v2 = vld [vmem:[%s3312_s1 + $0x3e0] sm:$0xff]  ;;  %v149_v3 = vld [vmem:[%s3312_s1 + $0x3f0] sm:$0xff]  ;;  %v144_v4 = vld [vmem:[%s3312_s1 + $0x3c8] sm:$0xff] }
  0x18   :  { %195 = vmatprep.subr.mxu0 %v40_v44  ;;  %266 = vmatprep.subr.mxu1 %v42_v45  ;;  %v146_v5 = vld [vmem:[%s3312_s1 + $0x3d8] sm:$0xff]  ;;  %v143_v6 = vld [vmem:[%s3312_s1 + $0x3c0] sm:$0xff]  ;;  %v145_v7 = vld [vmem:[%s3312_s1 + $0x3d0] sm:$0xff] }
  0x19   :  { %196 = vmatpush1.msra.mxu0 %v39_v46  ;;  %267 = vmatpush1.msra.mxu1 %v41_v47  ;;  %v140_v8 = vld [vmem:[%s3312_s1 + $0x3a8] sm:$0xff]  ;;  %v142_v9 = vld [vmem:[%s3312_s1 + $0x3b8] sm:$0xff]  ;;  %v139_v10 = vld [vmem:[%s3312_s1 + $0x3a0] sm:$0xff] }
  0x1a   :  { %197 = vmatprep.subr.mxu0 %v36_v48  ;;  %268 = vmatprep.subr.mxu1 %v38_v49  ;;  %v141_v11 = vld [vmem:[%s3312_s1 + $0x3b0] sm:$0xff]  ;;  %v136_v12 = vld [vmem:[%s3312_s1 + $0x388] sm:$0xff]  ;;  %v138_v13 = vld [vmem:[%s3312_s1 + $0x398] sm:$0xff] }
  0x1b   :  { %198 = vmatpush1.msra.mxu0 %v35_v50  ;;  %269 = vmatpush1.msra.mxu1 %v37_v51  ;;  %v135_v14 = vld [vmem:[%s3312_s1 + $0x380] sm:$0xff]  ;;  %v137_v15 = vld [vmem:[%s3312_s1 + $0x390] sm:$0xff]  ;;  %v132_v16 = vld [vmem:[%s3312_s1 + $0x368] sm:$0xff] }
  0x1c   :  { %199 = vmatprep.subr.mxu0 %v32_v52  ;;  %270 = vmatprep.subr.mxu1 %v34_v53  ;;  %v134_v17 = vld [vmem:[%s3312_s1 + $0x378] sm:$0xff]  ;;  %v131_v18 = vld [vmem:[%s3312_s1 + $0x360] sm:$0xff]  ;;  %v133_v19 = vld [vmem:[%s3312_s1 + $0x370] sm:$0xff] }
  0x1d   :  { %200 = vmatpush1.msra.mxu0 %v31_v54  ;;  %271 = vmatpush1.msra.mxu1 %v33_v55  ;;  %v128_v20 = vld [vmem:[%s3312_s1 + $0x348] sm:$0xff]  ;;  %v130_v21 = vld [vmem:[%s3312_s1 + $0x358] sm:$0xff]  ;;  %v127_v22 = vld [vmem:[%s3312_s1 + $0x340] sm:$0xff] }
  0x1e   :  { %201 = vmatprep.subr.mxu0 %v28_v56  ;;  %272 = vmatprep.subr.mxu1 %v30_v57  ;;  %v129_v23 = vld [vmem:[%s3312_s1 + $0x350] sm:$0xff]  ;;  %v124_v24 = vld [vmem:[%s3312_s1 + $0x328] sm:$0xff]  ;;  %v126_v25 = vld [vmem:[%s3312_s1 + $0x338] sm:$0xff] }
  0x1f   :  { %202 = vmatpush1.msra.mxu0 %v27_v58  ;;  %273 = vmatpush1.msra.mxu1 %v29_v59  ;;  %v123_v26 = vld [vmem:[%s3312_s1 + $0x320] sm:$0xff]  ;;  %v125_v27 = vld [vmem:[%s3312_s1 + $0x330] sm:$0xff]  ;;  %v120_v28 = vld [vmem:[%s3312_s1 + $0x308] sm:$0xff] }
  0x20   :  { %203 = vmatprep.subr.mxu0 %v24_v60  ;;  %274 = vmatprep.subr.mxu1 %v26_v61  ;;  %v122_v29 = vld [vmem:[%s3312_s1 + $0x318] sm:$0xff]  ;;  %v119_v30 = vld [vmem:[%s3312_s1 + $0x300] sm:$0xff]  ;;  %v121_v31 = vld [vmem:[%s3312_s1 + $0x310] sm:$0xff] }
  0x21   :  { %204 = vmatpush1.msra.mxu0 %v23_v62  ;;  %275 = vmatpush1.msra.mxu1 %v25_v63  ;;  %v116_v32 = vld [vmem:[%s3312_s1 + $0x2e8] sm:$0xff]  ;;  %v118_v33 = vld [vmem:[%s3312_s1 + $0x2f8] sm:$0xff]  ;;  %v115_v34 = vld [vmem:[%s3312_s1 + $0x2e0] sm:$0xff] }
  0x22   :  { %205 = vmatprep.subr.mxu0 %v148_v0  ;;  %276 = vmatprep.subr.mxu1 %v150_v1  ;;  %v117_v35 = vld [vmem:[%s3312_s1 + $0x2f0] sm:$0xff]  ;;  %v112_v36 = vld [vmem:[%s3312_s1 + $0x2c8] sm:$0xff]  ;;  %v114_v37 = vld [vmem:[%s3312_s1 + $0x2d8] sm:$0xff] }
  0x23   :  { %206 = vmatpush2.msra.mxu0 %v147_v2  ;;  %277 = vmatpush2.msra.mxu1 %v149_v3  ;;  %v111_v38 = vld [vmem:[%s3312_s1 + $0x2c0] sm:$0xff]  ;;  %v113_v39 = vld [vmem:[%s3312_s1 + $0x2d0] sm:$0xff]  ;;  %v108_v40 = vld [vmem:[%s3312_s1 + $0x2a8] sm:$0xff] }
  0x24   :  { %207 = vmatprep.subr.mxu0 %v144_v4  ;;  %278 = vmatprep.subr.mxu1 %v146_v5  ;;  %v110_v41 = vld [vmem:[%s3312_s1 + $0x2b8] sm:$0xff]  ;;  %v107_v42 = vld [vmem:[%s3312_s1 + $0x2a0] sm:$0xff]  ;;  %v109_v43 = vld [vmem:[%s3312_s1 + $0x2b0] sm:$0xff] }
  0x25   :  { %208 = vmatpush2.msra.mxu0 %v143_v6  ;;  %279 = vmatpush2.msra.mxu1 %v145_v7  ;;  %v104_v44 = vld [vmem:[%s3312_s1 + $0x288] sm:$0xff]  ;;  %v106_v45 = vld [vmem:[%s3312_s1 + $0x298] sm:$0xff]  ;;  %v103_v46 = vld [vmem:[%s3312_s1 + $0x280] sm:$0xff] }
  0x26   :  { %209 = vmatprep.subr.mxu0 %v140_v8  ;;  %280 = vmatprep.subr.mxu1 %v142_v9  ;;  %v105_v47 = vld [vmem:[%s3312_s1 + $0x290] sm:$0xff]  ;;  %v100_v48 = vld [vmem:[%s3312_s1 + $0x268] sm:$0xff]  ;;  %v102_v49 = vld [vmem:[%s3312_s1 + $0x278] sm:$0xff] }
  0x27   :  { %210 = vmatpush2.msra.mxu0 %v139_v10  ;;  %281 = vmatpush2.msra.mxu1 %v141_v11  ;;  %v99_v50 = vld [vmem:[%s3312_s1 + $0x260] sm:$0xff]  ;;  %v101_v51 = vld [vmem:[%s3312_s1 + $0x270] sm:$0xff]  ;;  %v96_v52 = vld [vmem:[%s3312_s1 + $0x248] sm:$0xff] }
  0x28   :  { %211 = vmatprep.subr.mxu0 %v136_v12  ;;  %282 = vmatprep.subr.mxu1 %v138_v13  ;;  %v98_v53 = vld [vmem:[%s3312_s1 + $0x258] sm:$0xff]  ;;  %v95_v54 = vld [vmem:[%s3312_s1 + $0x240] sm:$0xff]  ;;  %v97_v55 = vld [vmem:[%s3312_s1 + $0x250] sm:$0xff] }
  0x29   :  { %212 = vmatpush2.msra.mxu0 %v135_v14  ;;  %283 = vmatpush2.msra.mxu1 %v137_v15  ;;  %v92_v56 = vld [vmem:[%s3312_s1 + $0x228] sm:$0xff]  ;;  %v94_v57 = vld [vmem:[%s3312_s1 + $0x238] sm:$0xff]  ;;  %v91_v58 = vld [vmem:[%s3312_s1 + $0x220] sm:$0xff] }
  0x2a   :  { %213 = vmatprep.subr.mxu0 %v132_v16  ;;  %284 = vmatprep.subr.mxu1 %v134_v17  ;;  %v93_v59 = vld [vmem:[%s3312_s1 + $0x230] sm:$0xff]  ;;  %v88_v60 = vld [vmem:[%s3312_s1 + $0x208] sm:$0xff]  ;;  %v90_v61 = vld [vmem:[%s3312_s1 + $0x218] sm:$0xff] }
  0x2b   :  { %214 = vmatpush2.msra.mxu0 %v131_v18  ;;  %285 = vmatpush2.msra.mxu1 %v133_v19  ;;  %v87_v62 = vld [vmem:[%s3312_s1 + $0x200] sm:$0xff]  ;;  %v22_v63 = vld [vmem:[%s3311_s0 + $0x8] sm:$0xff]  ;;  %v89_v0 = vld [vmem:[%s3312_s1 + $0x210] sm:$0xff] }
  0x2c   :  { %215 = vmatprep.subr.mxu0 %v128_v20  ;;  %286 = vmatprep.subr.mxu1 %v130_v21  ;;  %v21_v1 = vld [vmem:[%s3311_s0] sm:$0xff]  ;;  %v429_v2 = vld [vmem:[%s3314_s3 + $0x350] sm:$0xff]  ;;  %v428_v4 = vld [vmem:[%s3314_s3 + $0x348] sm:$0xff] }
  0x2d   :  { %216 = vmatpush2.msra.mxu0 %v127_v22  ;;  %287 = vmatpush2.msra.mxu1 %v129_v23  ;;  %v653_v3 = vld [vmem:[%s3314_s3 + $0xa50] sm:$0xff]  ;;  %v652_v5 = vld [vmem:[%s3314_s3 + $0xa48] sm:$0xff]  ;;  %v422_v6 = vld [vmem:[%s3314_s3 + $0x318] sm:$0xff] }
  0x2e   :  { %217 = vmatprep.subr.mxu0 %v124_v24  ;;  %288 = vmatprep.subr.mxu1 %v126_v25  ;;  %v646_v7 = vld [vmem:[%s3314_s3 + $0xa18] sm:$0xff]  ;;  %v421_v8 = vld [vmem:[%s3314_s3 + $0x310] sm:$0xff]  ;;  %v415_v10 = vld [vmem:[%s3314_s3 + $0x2e0] sm:$0xff] }
  0x2f   :  { %218 = vmatpush2.msra.mxu0 %v123_v26  ;;  %289 = vmatpush2.msra.mxu1 %v125_v27  ;;  %v645_v9 = vld [vmem:[%s3314_s3 + $0xa10] sm:$0xff]  ;;  %v639_v11 = vld [vmem:[%s3314_s3 + $0x9e0] sm:$0xff]  ;;  %v414_v12 = vld [vmem:[%s3314_s3 + $0x2d8] sm:$0xff] }
  0x30   :  { %219 = vmatprep.subr.mxu0 %v120_v28  ;;  %290 = vmatprep.subr.mxu1 %v122_v29  ;;  %v638_v13 = vld [vmem:[%s3314_s3 + $0x9d8] sm:$0xff]  ;;  %v408_v14 = vld [vmem:[%s3314_s3 + $0x2a8] sm:$0xff]  ;;  %v407_v16 = vld [vmem:[%s3314_s3 + $0x2a0] sm:$0xff] }
  0x31   :  { %220 = vmatpush2.msra.mxu0 %v119_v30  ;;  %291 = vmatpush2.msra.mxu1 %v121_v31  ;;  %v632_v15 = vld [vmem:[%s3314_s3 + $0x9a8] sm:$0xff]  ;;  %v631_v17 = vld [vmem:[%s3314_s3 + $0x9a0] sm:$0xff]  ;;  %v401_v18 = vld [vmem:[%s3314_s3 + $0x270] sm:$0xff] }
  0x32   :  { %221 = vmatprep.subr.mxu0 %v116_v32  ;;  %292 = vmatprep.subr.mxu1 %v118_v33  ;;  %v625_v19 = vld [vmem:[%s3314_s3 + $0x970] sm:$0xff]  ;;  %v400_v20 = vld [vmem:[%s3314_s3 + $0x268] sm:$0xff]  ;;  %v394_v22 = vld [vmem:[%s3314_s3 + $0x238] sm:$0xff] }
  0x33   :  { %222 = vmatpush2.msra.mxu0 %v115_v34  ;;  %293 = vmatpush2.msra.mxu1 %v117_v35  ;;  %v624_v21 = vld [vmem:[%s3314_s3 + $0x968] sm:$0xff]  ;;  %v618_v23 = vld [vmem:[%s3314_s3 + $0x938] sm:$0xff]  ;;  %v393_v24 = vld [vmem:[%s3314_s3 + $0x230] sm:$0xff] }
  0x34   :  { %223 = vmatprep.subr.mxu0 %v112_v36  ;;  %294 = vmatprep.subr.mxu1 %v114_v37  ;;  %v617_v25 = vld [vmem:[%s3314_s3 + $0x930] sm:$0xff]  ;;  %v387_v26 = vld [vmem:[%s3314_s3 + $0x200] sm:$0xff]  ;;  %v386_v28 = vld [vmem:[%s3314_s3 + $0x1f8] sm:$0xff] }
  0x35   :  { %224 = vmatpush2.msra.mxu0 %v111_v38  ;;  %295 = vmatpush2.msra.mxu1 %v113_v39  ;;  %v611_v27 = vld [vmem:[%s3314_s3 + $0x900] sm:$0xff]  ;;  %v610_v29 = vld [vmem:[%s3314_s3 + $0x8f8] sm:$0xff]  ;;  %v380_v30 = vld [vmem:[%s3314_s3 + $0x1c8] sm:$0xff] }
  0x36   :  { %225 = vmatprep.subr.mxu0 %v108_v40  ;;  %296 = vmatprep.subr.mxu1 %v110_v41  ;;  %v604_v31 = vld [vmem:[%s3314_s3 + $0x8c8] sm:$0xff]  ;;  %v379_v32 = vld [vmem:[%s3314_s3 + $0x1c0] sm:$0xff]  ;;  %v373_v34 = vld [vmem:[%s3314_s3 + $0x190] sm:$0xff] }
  0x37   :  { %226 = vmatpush2.msra.mxu0 %v107_v42  ;;  %297 = vmatpush2.msra.mxu1 %v109_v43  ;;  %v603_v33 = vld [vmem:[%s3314_s3 + $0x8c0] sm:$0xff]  ;;  %v597_v35 = vld [vmem:[%s3314_s3 + $0x890] sm:$0xff] }
  0x38   :  { %227 = vmatprep.subr.mxu0 %v104_v44  ;;  %298 = vmatprep.subr.mxu1 %v106_v45 }
  0x39   :  { %228 = vmatpush2.msra.mxu0 %v103_v46  ;;  %299 = vmatpush2.msra.mxu1 %v105_v47 }
  0x3a   :  { %229 = vmatprep.subr.mxu0 %v100_v48  ;;  %300 = vmatprep.subr.mxu1 %v102_v49 }
  0x3b   :  { %230 = vmatpush2.msra.mxu0 %v99_v50  ;;  %301 = vmatpush2.msra.mxu1 %v101_v51 }
  0x3c   :  { %231 = vmatprep.subr.mxu0 %v96_v52  ;;  %302 = vmatprep.subr.mxu1 %v98_v53 }
  0x3d   :  { %232 = vmatpush2.msra.mxu0 %v95_v54  ;;  %303 = vmatpush2.msra.mxu1 %v97_v55 }
  0x3e   :  { %233 = vmatprep.subr.mxu0 %v92_v56  ;;  %304 = vmatprep.subr.mxu1 %v94_v57 }
  0x3f   :  { %234 = vmatpush2.msra.mxu0 %v91_v58  ;;  %305 = vmatpush2.msra.mxu1 %v93_v59 }
  0x40   :  { %235 = vmatprep.subr.mxu0 %v88_v60  ;;  %306 = vmatprep.subr.mxu1 %v90_v61 }
  0x41   :  { %236 = vmatpush2.msra.mxu0 %v87_v62  ;;  %237 = vmatprep.mubr.f32.mxu0 %v22_v63 }
  0x42   :  { %307 = vmatpush2.msra.mxu1 %v89_v0  ;;  %308 = vmatprep.mubr.f32.mxu1 %v22_v63 }
  0x43   :  { %238 = vmatmul.mubr.f32.vlgmr.msra.gmra.mxu0 %v21_v1  ;;  %309 = vmatmul.mubr.f32.vlgmr.msra.gmra.mxu1 %v21_v1 }
  0x44   :  { %808 = vmatprep.subr.mxu0 %v429_v2  ;;  %879 = vmatprep.subr.mxu1 %v653_v3 }
  0x45   :  { %809 = vmatpush1.msra.mxu0 %v428_v4  ;;  %880 = vmatpush1.msra.mxu1 %v652_v5 }
  0x46   :  { %810 = vmatprep.subr.mxu0 %v422_v6  ;;  %881 = vmatprep.subr.mxu1 %v646_v7 }
  0x47   :  { %811 = vmatpush1.msra.mxu0 %v421_v8  ;;  %882 = vmatpush1.msra.mxu1 %v645_v9 }
  0x48   :  { %812 = vmatprep.subr.mxu0 %v415_v10  ;;  %883 = vmatprep.subr.mxu1 %v639_v11 }
  0x49   :  { %813 = vmatpush1.msra.mxu0 %v414_v12  ;;  %884 = vmatpush1.msra.mxu1 %v638_v13 }
  0x4a   :  { %814 = vmatprep.subr.mxu0 %v408_v14  ;;  %885 = vmatprep.subr.mxu1 %v632_v15 }
  0x4b   :  { %815 = vmatpush1.msra.mxu0 %v407_v16  ;;  %886 = vmatpush1.msra.mxu1 %v631_v17 }
  0x4c   :  { %816 = vmatprep.subr.mxu0 %v401_v18  ;;  %887 = vmatprep.subr.mxu1 %v625_v19 }
  0x4d   :  { %817 = vmatpush1.msra.mxu0 %v400_v20  ;;  %888 = vmatpush1.msra.mxu1 %v624_v21 }
  0x4e   :  { %818 = vmatprep.subr.mxu0 %v394_v22  ;;  %889 = vmatprep.subr.mxu1 %v618_v23 }
  0x4f   :  { %819 = vmatpush1.msra.mxu0 %v393_v24  ;;  %890 = vmatpush1.msra.mxu1 %v617_v25 }
  0x50   :  { %820 = vmatprep.subr.mxu0 %v387_v26  ;;  %891 = vmatprep.subr.mxu1 %v611_v27 }
  0x51   :  { %821 = vmatpush1.msra.mxu0 %v386_v28  ;;  %892 = vmatpush1.msra.mxu1 %v610_v29 }
  0x52   :  { %10 = vsyncpa [#allocation3], 0  ;;  %822 = vmatprep.subr.mxu0 %v380_v30  ;;  %893 = vmatprep.subr.mxu1 %v604_v31  ;;  %v372_v36 = vld [vmem:[%s3314_s3 + $0x188] sm:$0xff]  ;;  %v366_v38 = vld [vmem:[%s3314_s3 + $0x158] sm:$0xff] }
  0x53   :  { %v596_v37 = vld [vmem:[%s3314_s3 + $0x888] sm:$0xff]  ;;  %823 = vmatpush1.msra.mxu0 %v379_v32  ;;  %894 = vmatpush1.msra.mxu1 %v603_v33  ;;  %v590_v39 = vld [vmem:[%s3314_s3 + $0x858] sm:$0xff]  ;;  %v365_v40 = vld [vmem:[%s3314_s3 + $0x150] sm:$0xff] }
  0x54   :  { %824 = vmatprep.subr.mxu0 %v373_v34  ;;  %895 = vmatprep.subr.mxu1 %v597_v35  ;;  %v589_v41 = vld [vmem:[%s3314_s3 + $0x850] sm:$0xff]  ;;  %v359_v42 = vld [vmem:[%s3314_s3 + $0x120] sm:$0xff]  ;;  %v358_v44 = vld [vmem:[%s3314_s3 + $0x118] sm:$0xff] }
  0x55   :  { %825 = vmatpush1.msra.mxu0 %v372_v36  ;;  %896 = vmatpush1.msra.mxu1 %v596_v37  ;;  %v583_v43 = vld [vmem:[%s3314_s3 + $0x820] sm:$0xff]  ;;  %v582_v45 = vld [vmem:[%s3314_s3 + $0x818] sm:$0xff]  ;;  %v352_v46 = vld [vmem:[%s3314_s3 + $0xe8] sm:$0xff] }
  0x56   :  { %826 = vmatprep.subr.mxu0 %v366_v38  ;;  %897 = vmatprep.subr.mxu1 %v590_v39  ;;  %v576_v47 = vld [vmem:[%s3314_s3 + $0x7e8] sm:$0xff]  ;;  %v351_v48 = vld [vmem:[%s3314_s3 + $0xe0] sm:$0xff]  ;;  %v345_v50 = vld [vmem:[%s3314_s3 + $0xb0] sm:$0xff] }
  0x57   :  { %827 = vmatpush1.msra.mxu0 %v365_v40  ;;  %898 = vmatpush1.msra.mxu1 %v589_v41  ;;  %v575_v49 = vld [vmem:[%s3314_s3 + $0x7e0] sm:$0xff]  ;;  %v569_v51 = vld [vmem:[%s3314_s3 + $0x7b0] sm:$0xff]  ;;  %v344_v52 = vld [vmem:[%s3314_s3 + $0xa8] sm:$0xff] }
  0x58   :  { %828 = vmatprep.subr.mxu0 %v359_v42  ;;  %899 = vmatprep.subr.mxu1 %v583_v43  ;;  %v568_v53 = vld [vmem:[%s3314_s3 + $0x7a8] sm:$0xff]  ;;  %v338_v54 = vld [vmem:[%s3314_s3 + $0x78] sm:$0xff]  ;;  %v337_v56 = vld [vmem:[%s3314_s3 + $0x70] sm:$0xff] }
  0x59   :  { %829 = vmatpush1.msra.mxu0 %v358_v44  ;;  %900 = vmatpush1.msra.mxu1 %v582_v45  ;;  %v562_v55 = vld [vmem:[%s3314_s3 + $0x778] sm:$0xff]  ;;  %v561_v57 = vld [vmem:[%s3314_s3 + $0x770] sm:$0xff]  ;;  %v331_v58 = vld [vmem:[%s3314_s3 + $0x40] sm:$0xff] }
  0x5a   :  { %830 = vmatprep.subr.mxu0 %v352_v46  ;;  %901 = vmatprep.subr.mxu1 %v576_v47  ;;  %v555_v59 = vld [vmem:[%s3314_s3 + $0x740] sm:$0xff]  ;;  %v330_v60 = vld [vmem:[%s3314_s3 + $0x38] sm:$0xff]  ;;  %v324_v62 = vld [vmem:[%s3314_s3 + $0x8] sm:$0xff] }
  0x5b   :  { %831 = vmatpush1.msra.mxu0 %v351_v48  ;;  %902 = vmatpush1.msra.mxu1 %v575_v49  ;;  %v554_v61 = vld [vmem:[%s3314_s3 + $0x738] sm:$0xff]  ;;  %v548_v63 = vld [vmem:[%s3314_s3 + $0x708] sm:$0xff]  ;;  %v323_v0 = vld [vmem:[%s3314_s3] sm:$0xff] }
  0x5c   :  { %832 = vmatprep.subr.mxu0 %v345_v50  ;;  %903 = vmatprep.subr.mxu1 %v569_v51  ;;  %v547_v1 = vld [vmem:[%s3314_s3 + $0x700] sm:$0xff]  ;;  %v541_v2 = vld [vmem:[%s3314_s3 + $0x6d0] sm:$0xff]  ;;  %v540_v4 = vld [vmem:[%s3314_s3 + $0x6c8] sm:$0xff] }
  0x5d   :  { %833 = vmatpush1.msra.mxu0 %v344_v52  ;;  %904 = vmatpush1.msra.mxu1 %v568_v53  ;;  %v765_v3 = vld [vmem:[%s3314_s3 + $0xdd0] sm:$0xff]  ;;  %v764_v5 = vld [vmem:[%s3314_s3 + $0xdc8] sm:$0xff]  ;;  %v534_v6 = vld [vmem:[%s3314_s3 + $0x698] sm:$0xff] }
  0x5e   :  { %834 = vmatprep.subr.mxu0 %v338_v54  ;;  %905 = vmatprep.subr.mxu1 %v562_v55  ;;  %v758_v7 = vld [vmem:[%s3314_s3 + $0xd98] sm:$0xff]  ;;  %v533_v8 = vld [vmem:[%s3314_s3 + $0x690] sm:$0xff]  ;;  %v527_v10 = vld [vmem:[%s3314_s3 + $0x660] sm:$0xff] }
  0x5f   :  { %835 = vmatpush1.msra.mxu0 %v337_v56  ;;  %906 = vmatpush1.msra.mxu1 %v561_v57  ;;  %v757_v9 = vld [vmem:[%s3314_s3 + $0xd90] sm:$0xff]  ;;  %v751_v11 = vld [vmem:[%s3314_s3 + $0xd60] sm:$0xff]  ;;  %v526_v12 = vld [vmem:[%s3314_s3 + $0x658] sm:$0xff] }
  0x60   :  { %836 = vmatprep.subr.mxu0 %v331_v58  ;;  %907 = vmatprep.subr.mxu1 %v555_v59  ;;  %v750_v13 = vld [vmem:[%s3314_s3 + $0xd58] sm:$0xff]  ;;  %v520_v14 = vld [vmem:[%s3314_s3 + $0x628] sm:$0xff]  ;;  %v519_v16 = vld [vmem:[%s3314_s3 + $0x620] sm:$0xff] }
  0x61   :  { %837 = vmatpush1.msra.mxu0 %v330_v60  ;;  %908 = vmatpush1.msra.mxu1 %v554_v61  ;;  %v744_v15 = vld [vmem:[%s3314_s3 + $0xd28] sm:$0xff]  ;;  %v743_v17 = vld [vmem:[%s3314_s3 + $0xd20] sm:$0xff]  ;;  %v513_v18 = vld [vmem:[%s3314_s3 + $0x5f0] sm:$0xff] }
  0x62   :  { %838 = vmatprep.subr.mxu0 %v324_v62  ;;  %909 = vmatprep.subr.mxu1 %v548_v63  ;;  %v737_v19 = vld [vmem:[%s3314_s3 + $0xcf0] sm:$0xff]  ;;  %v512_v20 = vld [vmem:[%s3314_s3 + $0x5e8] sm:$0xff]  ;;  %v506_v22 = vld [vmem:[%s3314_s3 + $0x5b8] sm:$0xff] }
  0x63   :  { %839 = vmatpush1.msra.mxu0 %v323_v0  ;;  %910 = vmatpush1.msra.mxu1 %v547_v1  ;;  %v736_v21 = vld [vmem:[%s3314_s3 + $0xce8] sm:$0xff]  ;;  %v730_v23 = vld [vmem:[%s3314_s3 + $0xcb8] sm:$0xff]  ;;  %v505_v24 = vld [vmem:[%s3314_s3 + $0x5b0] sm:$0xff] }
  0x64   :  { %840 = vmatprep.subr.mxu0 %v541_v2  ;;  %911 = vmatprep.subr.mxu1 %v765_v3  ;;  %v729_v25 = vld [vmem:[%s3314_s3 + $0xcb0] sm:$0xff]  ;;  %v499_v26 = vld [vmem:[%s3314_s3 + $0x580] sm:$0xff]  ;;  %v498_v28 = vld [vmem:[%s3314_s3 + $0x578] sm:$0xff] }
  0x65   :  { %841 = vmatpush2.msra.mxu0 %v540_v4  ;;  %912 = vmatpush2.msra.mxu1 %v764_v5  ;;  %v723_v27 = vld [vmem:[%s3314_s3 + $0xc80] sm:$0xff]  ;;  %v722_v29 = vld [vmem:[%s3314_s3 + $0xc78] sm:$0xff]  ;;  %v492_v30 = vld [vmem:[%s3314_s3 + $0x548] sm:$0xff]  ;;  %v153_v4 = vlaneseq }
  0x66   :  { %842 = vmatprep.subr.mxu0 %v534_v6  ;;  %913 = vmatprep.subr.mxu1 %v758_v7  ;;  %v716_v31 = vld [vmem:[%s3314_s3 + $0xc48] sm:$0xff]  ;;  %v491_v32 = vld [vmem:[%s3314_s3 + $0x540] sm:$0xff]  ;;  %v485_v34 = vld [vmem:[%s3314_s3 + $0x510] sm:$0xff] }
  0x67   :  { %843 = vmatpush2.msra.mxu0 %v533_v8  ;;  %914 = vmatpush2.msra.mxu1 %v757_v9  ;;  %v715_v33 = vld [vmem:[%s3314_s3 + $0xc40] sm:$0xff]  ;;  %v709_v35 = vld [vmem:[%s3314_s3 + $0xc10] sm:$0xff]  ;;  %v484_v36 = vld [vmem:[%s3314_s3 + $0x508] sm:$0xff]  ;;  %v2299_v5 = vshrl.u32 %v153_v4, 7 }
  0x68   :  { %844 = vmatprep.subr.mxu0 %v527_v10  ;;  %915 = vmatprep.subr.mxu1 %v751_v11  ;;  %v708_v37 = vld [vmem:[%s3314_s3 + $0xc08] sm:$0xff]  ;;  %v478_v38 = vld [vmem:[%s3314_s3 + $0x4d8] sm:$0xff]  ;;  %v477_v40 = vld [vmem:[%s3314_s3 + $0x4d0] sm:$0xff] }
  0x69   :  { %845 = vmatpush2.msra.mxu0 %v526_v12  ;;  %916 = vmatpush2.msra.mxu1 %v750_v13  ;;  %v702_v39 = vld [vmem:[%s3314_s3 + $0xbd8] sm:$0xff]  ;;  %v701_v41 = vld [vmem:[%s3314_s3 + $0xbd0] sm:$0xff]  ;;  %v471_v42 = vld [vmem:[%s3314_s3 + $0x4a0] sm:$0xff]  ;;  %v155_v6 = vsub.s32 0, %v2299_v5  ;;  %v163_v7 = vsub.s32 2, %v2299_v5  ;;  %v159_v9 = vsub.s32 1, %v2299_v5 }
  0x6a   :  { %846 = vmatprep.subr.mxu0 %v520_v14  ;;  %917 = vmatprep.subr.mxu1 %v744_v15  ;;  %v695_v43 = vld [vmem:[%s3314_s3 + $0xba0] sm:$0xff]  ;;  %v470_v44 = vld [vmem:[%s3314_s3 + $0x498] sm:$0xff]  ;;  %v464_v46 = vld [vmem:[%s3314_s3 + $0x468] sm:$0xff]  ;;  %v167_v10 = vsub.s32 3, %v2299_v5 }
  0x6b   :  { %847 = vmatpush2.msra.mxu0 %v519_v16  ;;  %918 = vmatpush2.msra.mxu1 %v743_v17  ;;  %v694_v45 = vld [vmem:[%s3314_s3 + $0xb98] sm:$0xff]  ;;  %v688_v47 = vld [vmem:[%s3314_s3 + $0xb68] sm:$0xff]  ;;  %v463_v48 = vld [vmem:[%s3314_s3 + $0x460] sm:$0xff] }
  0x6c   :  { %848 = vmatprep.subr.mxu0 %v513_v18  ;;  %919 = vmatprep.subr.mxu1 %v737_v19  ;;  %v687_v49 = vld [vmem:[%s3314_s3 + $0xb60] sm:$0xff]  ;;  %v457_v50 = vld [vmem:[%s3314_s3 + $0x430] sm:$0xff]  ;;  %v456_v52 = vld [vmem:[%s3314_s3 + $0x428] sm:$0xff] }
  0x6d   :  { %849 = vmatpush2.msra.mxu0 %v512_v20  ;;  %920 = vmatpush2.msra.mxu1 %v736_v21  ;;  %v681_v51 = vld [vmem:[%s3314_s3 + $0xb30] sm:$0xff]  ;;  %v680_v53 = vld [vmem:[%s3314_s3 + $0xb28] sm:$0xff]  ;;  %v450_v54 = vld [vmem:[%s3314_s3 + $0x3f8] sm:$0xff] }
  0x6e   :  { %850 = vmatprep.subr.mxu0 %v506_v22  ;;  %921 = vmatprep.subr.mxu1 %v730_v23  ;;  %v674_v55 = vld [vmem:[%s3314_s3 + $0xaf8] sm:$0xff]  ;;  %v449_v56 = vld [vmem:[%s3314_s3 + $0x3f0] sm:$0xff]  ;;  %v443_v58 = vld [vmem:[%s3314_s3 + $0x3c0] sm:$0xff] }
  0x6f   :  { %851 = vmatpush2.msra.mxu0 %v505_v24  ;;  %922 = vmatpush2.msra.mxu1 %v729_v25  ;;  %v673_v57 = vld [vmem:[%s3314_s3 + $0xaf0] sm:$0xff]  ;;  %v667_v59 = vld [vmem:[%s3314_s3 + $0xac0] sm:$0xff]  ;;  %v442_v60 = vld [vmem:[%s3314_s3 + $0x3b8] sm:$0xff] }
  0x70   :  { %852 = vmatprep.subr.mxu0 %v499_v26  ;;  %923 = vmatprep.subr.mxu1 %v723_v27  ;;  %v666_v61 = vld [vmem:[%s3314_s3 + $0xab8] sm:$0xff]  ;;  %v436_v62 = vld [vmem:[%s3314_s3 + $0x388] sm:$0xff]  ;;  %v435_v0 = vld [vmem:[%s3314_s3 + $0x380] sm:$0xff] }
  0x71   :  { %853 = vmatpush2.msra.mxu0 %v498_v28  ;;  %924 = vmatpush2.msra.mxu1 %v722_v29  ;;  %v660_v63 = vld [vmem:[%s3314_s3 + $0xa88] sm:$0xff]  ;;  %v659_v1 = vld [vmem:[%s3314_s3 + $0xa80] sm:$0xff] }
  0x72   :  { %854 = vmatprep.subr.mxu0 %v492_v30  ;;  %925 = vmatprep.subr.mxu1 %v716_v31  ;;  %v431_v2 = vld [vmem:[%s3314_s3 + $0x360] sm:$0xff]  ;;  %v430_v31 = vld [vmem:[%s3314_s3 + $0x358] sm:$0xff] }
  0x73   :  { %855 = vmatpush2.msra.mxu0 %v491_v32  ;;  %926 = vmatpush2.msra.mxu1 %v715_v33  ;;  %v655_v3 = vld [vmem:[%s3314_s3 + $0xa60] sm:$0xff]  ;;  %v654_v32 = vld [vmem:[%s3314_s3 + $0xa58] sm:$0xff]  ;;  %v424_v33 = vld [vmem:[%s3314_s3 + $0x328] sm:$0xff] }
  0x74   :  { %856 = vmatprep.subr.mxu0 %v485_v34  ;;  %927 = vmatprep.subr.mxu1 %v709_v35  ;;  %v151_v8 = vld [vmem:[%s3313_s2] sm:$0xf]  ;;  %v648_v34 = vld [vmem:[%s3314_s3 + $0xa28] sm:$0xff] }
  0x75   :  { %857 = vmatpush2.msra.mxu0 %v484_v36  ;;  %928 = vmatpush2.msra.mxu1 %v708_v37  ;;  %v156_v11 = vrot.slane %v151_v8, %v155_v6  ;;  %v164_v12 = vrot.slane %v151_v8, %v163_v7  ;;  %v160_v13 = vrot.slane %v151_v8, %v159_v9  ;;  %v423_v35 = vld [vmem:[%s3314_s3 + $0x320] sm:$0xff]  ;;  %v417_v37 = vld [vmem:[%s3314_s3 + $0x2f0] sm:$0xff] }
  0x76   :  { %858 = vmatprep.subr.mxu0 %v478_v38  ;;  %929 = vmatprep.subr.mxu1 %v702_v39  ;;  %v168_v14 = vrot.slane %v151_v8, %v167_v10  ;;  %v647_v36 = vld [vmem:[%s3314_s3 + $0xa20] sm:$0xff]  ;;  %v641_v38 = vld [vmem:[%s3314_s3 + $0x9f0] sm:$0xff]  ;;  %v416_v39 = vld [vmem:[%s3314_s3 + $0x2e8] sm:$0xff] }
  0x77   :  { %859 = vmatpush2.msra.mxu0 %v477_v40  ;;  %930 = vmatpush2.msra.mxu1 %v701_v41  ;;  %v640_v40 = vld [vmem:[%s3314_s3 + $0x9e8] sm:$0xff]  ;;  %v410_v41 = vld [vmem:[%s3314_s3 + $0x2b8] sm:$0xff]  ;;  %v591_v4 = vld [vmem:[%s3314_s3 + $0x860] sm:$0xff] }
  0x78   :  { %860 = vmatprep.subr.mxu0 %v471_v42  ;;  %931 = vmatprep.subr.mxu1 %v695_v43  ;;  %v634_v42 = vld [vmem:[%s3314_s3 + $0x9b8] sm:$0xff]  ;;  %v409_v43 = vld [vmem:[%s3314_s3 + $0x2b0] sm:$0xff] }
  0x79   :  { %861 = vmatpush2.msra.mxu0 %v470_v44  ;;  %932 = vmatpush2.msra.mxu1 %v694_v45  ;;  %v633_v44 = vld [vmem:[%s3314_s3 + $0x9b0] sm:$0xff]  ;;  %v403_v45 = vld [vmem:[%s3314_s3 + $0x280] sm:$0xff] }
  0x7a   :  { %862 = vmatprep.subr.mxu0 %v464_v46  ;;  %933 = vmatprep.subr.mxu1 %v688_v47  ;;  %v627_v46 = vld [vmem:[%s3314_s3 + $0x980] sm:$0xff]  ;;  %v402_v47 = vld [vmem:[%s3314_s3 + $0x278] sm:$0xff]  ;;  %v361_v8 = vld [vmem:[%s3314_s3 + $0x130] sm:$0xff] }
  0x7b   :  { %863 = vmatpush2.msra.mxu0 %v463_v48  ;;  %934 = vmatpush2.msra.mxu1 %v687_v49  ;;  %v626_v48 = vld [vmem:[%s3314_s3 + $0x978] sm:$0xff]  ;;  %v396_v49 = vld [vmem:[%s3314_s3 + $0x248] sm:$0xff] }
  0x7c   :  { %864 = vmatprep.subr.mxu0 %v457_v50  ;;  %935 = vmatprep.subr.mxu1 %v681_v51  ;;  %v620_v50 = vld [vmem:[%s3314_s3 + $0x948] sm:$0xff]  ;;  %v395_v51 = vld [vmem:[%s3314_s3 + $0x240] sm:$0xff] }
  0x7d   :  { %865 = vmatpush2.msra.mxu0 %v456_v52  ;;  %936 = vmatpush2.msra.mxu1 %v680_v53  ;;  %v619_v52 = vld [vmem:[%s3314_s3 + $0x940] sm:$0xff]  ;;  %v389_v53 = vld [vmem:[%s3314_s3 + $0x210] sm:$0xff] }
  0x7e   :  { %866 = vmatprep.subr.mxu0 %v450_v54  ;;  %937 = vmatprep.subr.mxu1 %v674_v55  ;;  %v613_v54 = vld [vmem:[%s3314_s3 + $0x910] sm:$0xff]  ;;  %v388_v55 = vld [vmem:[%s3314_s3 + $0x208] sm:$0xff] }
  0x7f   :  { %867 = vmatpush2.msra.mxu0 %v449_v56  ;;  %938 = vmatpush2.msra.mxu1 %v673_v57  ;;  %v612_v56 = vld [vmem:[%s3314_s3 + $0x908] sm:$0xff]  ;;  %v382_v57 = vld [vmem:[%s3314_s3 + $0x1d8] sm:$0xff] }
  0x80   :  { %868 = vmatprep.subr.mxu0 %v443_v58  ;;  %939 = vmatprep.subr.mxu1 %v667_v59  ;;  %v606_v58 = vld [vmem:[%s3314_s3 + $0x8d8] sm:$0xff]  ;;  %v381_v59 = vld [vmem:[%s3314_s3 + $0x1d0] sm:$0xff] }
  0x81   :  { %869 = vmatpush2.msra.mxu0 %v442_v60  ;;  %940 = vmatpush2.msra.mxu1 %v666_v61  ;;  %v605_v60 = vld [vmem:[%s3314_s3 + $0x8d0] sm:$0xff]  ;;  %v375_v61 = vld [vmem:[%s3314_s3 + $0x1a0] sm:$0xff] }
  0x82   :  { %870 = vmatprep.subr.mxu0 %v436_v62  ;;  %941 = vmatprep.subr.mxu1 %v660_v63  ;;  %v599_v62 = vld [vmem:[%s3314_s3 + $0x8a0] sm:$0xff]  ;;  %v374_v63 = vld [vmem:[%s3314_s3 + $0x198] sm:$0xff] }
  0x83   :  { %871 = vmatpush2.msra.mxu0 %v435_v0  ;;  %942 = vmatpush2.msra.mxu1 %v659_v1  ;;  %v598_v0 = vld [vmem:[%s3314_s3 + $0x898] sm:$0xff]  ;;  %v368_v1 = vld [vmem:[%s3314_s3 + $0x168] sm:$0xff] }
  0x84   :  { %950 = vmatprep.subr.mxu0 %v431_v2  ;;  %1021 = vmatprep.subr.mxu1 %v655_v3  ;;  %v592_v2 = vld [vmem:[%s3314_s3 + $0x868] sm:$0xff]  ;;  %v367_v3 = vld [vmem:[%s3314_s3 + $0x160] sm:$0xff] }
 0x103   :  { %v239_v15 = vpop.f32.mrf.mxu0  ;;  %v310_v16 = vpop.f32.mrf.mxu1 }
 0x104   :  { %v240_v17 = vadd.f32 %v239_v15, %v156_v11  ;;  %v311_v18 = vadd.f32 %v310_v16, %v164_v12  ;;  %v585_v11 = vld [vmem:[%s3314_s3 + $0x830] sm:$0xff]  ;;  %v360_v12 = vld [vmem:[%s3314_s3 + $0x128] sm:$0xff]  ;;  %v578_v15 = vld [vmem:[%s3314_s3 + $0x7f8] sm:$0xff] }
 0x105   :  { %v241_v19 = vpop.f32.mrf.mxu0  ;;  %v312_v20 = vpop.f32.mrf.mxu1  ;;  %v353_v16 = vld [vmem:[%s3314_s3 + $0xf0] sm:$0xff] }
 0x106   :  { %v242_v21 = vadd.f32 %v241_v19, %v160_v13  ;;  %v313_v22 = vadd.f32 %v312_v20, %v168_v14  ;;  %v315_v23 = vmul.f32 0.2, %v240_v17  ;;  %v317_v24 = vmul.f32 0.2, %v311_v18  ;;  %v584_v13 = vld [vmem:[%s3314_s3 + $0x828] sm:$0xff]  ;;  %v354_v14 = vld [vmem:[%s3314_s3 + $0xf8] sm:$0xff] }
 0x107   :  { %v571_v19 = vld [vmem:[%s3314_s3 + $0x7c0] sm:$0xff]  ;;  %v346_v20 = vld [vmem:[%s3314_s3 + $0xb8] sm:$0xff] }
 0x108   :  { %v316_v25 = vmul.f32 0.2, %v242_v21  ;;  %v318_v26 = vmul.f32 0.2, %v313_v22  ;;  %v2320_v29 = vmax.f32 %v240_v17, %v315_v23  ;;  %v2322_v30 = vmax.f32 %v311_v18, %v317_v24  ;;  %v577_v17 = vld [vmem:[%s3314_s3 + $0x7f0] sm:$0xff]  ;;  %v347_v18 = vld [vmem:[%s3314_s3 + $0xc0] sm:$0xff] }
 0x109   :  { %v564_v23 = vld [vmem:[%s3314_s3 + $0x788] sm:$0xff]  ;;  %v339_v24 = vld [vmem:[%s3314_s3 + $0x80] sm:$0xff] }
 0x10a   :  { %v2316_v27 = vmax.f32 %v242_v21, %v316_v25  ;;  %v2318_v28 = vmax.f32 %v313_v22, %v318_v26  ;;  %v570_v21 = vld [vmem:[%s3314_s3 + $0x7b8] sm:$0xff]  ;;  %v340_v22 = vld [vmem:[%s3314_s3 + $0x88] sm:$0xff]  ;;  %v563_v25 = vld [vmem:[%s3314_s3 + $0x780] sm:$0xff] }
 0x10b   :  { %v333_v26 = vld [vmem:[%s3314_s3 + $0x50] sm:$0xff] }
 0x10c   :  { %872 = vmatprep.mubr.f32.mxu0 %v2316_v27  ;;  %943 = vmatprep.mubr.f32.mxu1 %v2318_v28 }
 0x10d   :  { %873 = vmatmul.mubr.f32.vlgmr.msra.gmra.mxu0 %v2320_v29  ;;  %944 = vmatmul.mubr.f32.vlgmr.msra.gmra.mxu1 %v2322_v30 }
 0x10e   :  { %951 = vmatpush1.msra.mxu0 %v430_v31  ;;  %1022 = vmatpush1.msra.mxu1 %v654_v32  ;;  %v557_v31 = vld [vmem:[%s3314_s3 + $0x750] sm:$0xff]  ;;  %v332_v32 = vld [vmem:[%s3314_s3 + $0x48] sm:$0xff] }
 0x10f   :  { %952 = vmatprep.subr.mxu0 %v424_v33  ;;  %1014 = vmatprep.mubr.f32.mxu0 %v2316_v27  ;;  %v556_v33 = vld [vmem:[%s3314_s3 + $0x748] sm:$0xff] }
 0x110   :  { %1023 = vmatprep.subr.mxu1 %v648_v34  ;;  %1085 = vmatprep.mubr.f32.mxu1 %v2318_v28  ;;  %v326_v34 = vld [vmem:[%s3314_s3 + $0x18] sm:$0xff] }
 0x111   :  { %953 = vmatpush1.msra.mxu0 %v423_v35  ;;  %1024 = vmatpush1.msra.mxu1 %v647_v36  ;;  %v550_v35 = vld [vmem:[%s3314_s3 + $0x718] sm:$0xff]  ;;  %v325_v36 = vld [vmem:[%s3314_s3 + $0x10] sm:$0xff] }
 0x112   :  { %954 = vmatprep.subr.mxu0 %v417_v37  ;;  %1025 = vmatprep.subr.mxu1 %v641_v38  ;;  %v549_v37 = vld [vmem:[%s3314_s3 + $0x710] sm:$0xff]  ;;  %v543_v38 = vld [vmem:[%s3314_s3 + $0x6e0] sm:$0xff] }
 0x113   :  { %955 = vmatpush1.msra.mxu0 %v416_v39  ;;  %1026 = vmatpush1.msra.mxu1 %v640_v40  ;;  %v767_v39 = vld [vmem:[%s3314_s3 + $0xde0] sm:$0xff]  ;;  %v542_v40 = vld [vmem:[%s3314_s3 + $0x6d8] sm:$0xff] }
 0x114   :  { %956 = vmatprep.subr.mxu0 %v410_v41  ;;  %1027 = vmatprep.subr.mxu1 %v634_v42  ;;  %v766_v41 = vld [vmem:[%s3314_s3 + $0xdd8] sm:$0xff]  ;;  %v536_v42 = vld [vmem:[%s3314_s3 + $0x6a8] sm:$0xff] }
 0x115   :  { %957 = vmatpush1.msra.mxu0 %v409_v43  ;;  %1028 = vmatpush1.msra.mxu1 %v633_v44  ;;  %v760_v43 = vld [vmem:[%s3314_s3 + $0xda8] sm:$0xff]  ;;  %v535_v44 = vld [vmem:[%s3314_s3 + $0x6a0] sm:$0xff] }
 0x116   :  { %958 = vmatprep.subr.mxu0 %v403_v45  ;;  %1029 = vmatprep.subr.mxu1 %v627_v46  ;;  %v759_v45 = vld [vmem:[%s3314_s3 + $0xda0] sm:$0xff]  ;;  %v529_v46 = vld [vmem:[%s3314_s3 + $0x670] sm:$0xff] }
 0x117   :  { %959 = vmatpush1.msra.mxu0 %v402_v47  ;;  %1030 = vmatpush1.msra.mxu1 %v626_v48  ;;  %v753_v47 = vld [vmem:[%s3314_s3 + $0xd70] sm:$0xff]  ;;  %v528_v48 = vld [vmem:[%s3314_s3 + $0x668] sm:$0xff] }
 0x118   :  { %960 = vmatprep.subr.mxu0 %v396_v49  ;;  %1031 = vmatprep.subr.mxu1 %v620_v50  ;;  %v752_v49 = vld [vmem:[%s3314_s3 + $0xd68] sm:$0xff]  ;;  %v522_v50 = vld [vmem:[%s3314_s3 + $0x638] sm:$0xff] }
 0x119   :  { %961 = vmatpush1.msra.mxu0 %v395_v51  ;;  %1032 = vmatpush1.msra.mxu1 %v619_v52  ;;  %v746_v51 = vld [vmem:[%s3314_s3 + $0xd38] sm:$0xff]  ;;  %v521_v52 = vld [vmem:[%s3314_s3 + $0x630] sm:$0xff] }
 0x11a   :  { %962 = vmatprep.subr.mxu0 %v389_v53  ;;  %1033 = vmatprep.subr.mxu1 %v613_v54  ;;  %v745_v53 = vld [vmem:[%s3314_s3 + $0xd30] sm:$0xff]  ;;  %v515_v54 = vld [vmem:[%s3314_s3 + $0x600] sm:$0xff] }
 0x11b   :  { %963 = vmatpush1.msra.mxu0 %v388_v55  ;;  %1034 = vmatpush1.msra.mxu1 %v612_v56  ;;  %v739_v55 = vld [vmem:[%s3314_s3 + $0xd00] sm:$0xff]  ;;  %v514_v56 = vld [vmem:[%s3314_s3 + $0x5f8] sm:$0xff] }
 0x11c   :  { %964 = vmatprep.subr.mxu0 %v382_v57  ;;  %1035 = vmatprep.subr.mxu1 %v606_v58  ;;  %v738_v57 = vld [vmem:[%s3314_s3 + $0xcf8] sm:$0xff]  ;;  %v508_v58 = vld [vmem:[%s3314_s3 + $0x5c8] sm:$0xff] }
 0x11d   :  { %965 = vmatpush1.msra.mxu0 %v381_v59  ;;  %1036 = vmatpush1.msra.mxu1 %v605_v60  ;;  %v732_v59 = vld [vmem:[%s3314_s3 + $0xcc8] sm:$0xff]  ;;  %v507_v60 = vld [vmem:[%s3314_s3 + $0x5c0] sm:$0xff] }
 0x11e   :  { %966 = vmatprep.subr.mxu0 %v375_v61  ;;  %1037 = vmatprep.subr.mxu1 %v599_v62  ;;  %v731_v61 = vld [vmem:[%s3314_s3 + $0xcc0] sm:$0xff]  ;;  %v501_v62 = vld [vmem:[%s3314_s3 + $0x590] sm:$0xff] }
 0x11f   :  { %967 = vmatpush1.msra.mxu0 %v374_v63  ;;  %1038 = vmatpush1.msra.mxu1 %v598_v0  ;;  %v725_v63 = vld [vmem:[%s3314_s3 + $0xc90] sm:$0xff]  ;;  %v500_v0 = vld [vmem:[%s3314_s3 + $0x588] sm:$0xff] }
 0x120   :  { %968 = vmatprep.subr.mxu0 %v368_v1  ;;  %1039 = vmatprep.subr.mxu1 %v592_v2  ;;  %v724_v1 = vld [vmem:[%s3314_s3 + $0xc88] sm:$0xff]  ;;  %v494_v2 = vld [vmem:[%s3314_s3 + $0x558] sm:$0xff] }
 0x121   :  { %969 = vmatpush1.msra.mxu0 %v367_v3  ;;  %1040 = vmatpush1.msra.mxu1 %v591_v4  ;;  %v718_v3 = vld [vmem:[%s3314_s3 + $0xc58] sm:$0xff]  ;;  %v493_v4 = vld [vmem:[%s3314_s3 + $0x550] sm:$0xff] }
 0x122   :  { %970 = vmatprep.subr.mxu0 %v361_v8  ;;  %1041 = vmatprep.subr.mxu1 %v585_v11  ;;  %v717_v8 = vld [vmem:[%s3314_s3 + $0xc50] sm:$0xff]  ;;  %v487_v11 = vld [vmem:[%s3314_s3 + $0x520] sm:$0xff] }
 0x123   :  { %971 = vmatpush1.msra.mxu0 %v360_v12  ;;  %1042 = vmatpush1.msra.mxu1 %v584_v13  ;;  %v711_v12 = vld [vmem:[%s3314_s3 + $0xc20] sm:$0xff]  ;;  %v486_v13 = vld [vmem:[%s3314_s3 + $0x518] sm:$0xff] }
 0x124   :  { %972 = vmatprep.subr.mxu0 %v354_v14  ;;  %1043 = vmatprep.subr.mxu1 %v578_v15  ;;  %v710_v14 = vld [vmem:[%s3314_s3 + $0xc18] sm:$0xff]  ;;  %v480_v15 = vld [vmem:[%s3314_s3 + $0x4e8] sm:$0xff] }
 0x125   :  { %973 = vmatpush1.msra.mxu0 %v353_v16  ;;  %1044 = vmatpush1.msra.mxu1 %v577_v17  ;;  %v704_v16 = vld [vmem:[%s3314_s3 + $0xbe8] sm:$0xff]  ;;  %v479_v17 = vld [vmem:[%s3314_s3 + $0x4e0] sm:$0xff] }
 0x126   :  { %974 = vmatprep.subr.mxu0 %v347_v18  ;;  %1045 = vmatprep.subr.mxu1 %v571_v19  ;;  %v703_v18 = vld [vmem:[%s3314_s3 + $0xbe0] sm:$0xff]  ;;  %v473_v19 = vld [vmem:[%s3314_s3 + $0x4b0] sm:$0xff] }
 0x127   :  { %975 = vmatpush1.msra.mxu0 %v346_v20  ;;  %1046 = vmatpush1.msra.mxu1 %v570_v21  ;;  %v697_v20 = vld [vmem:[%s3314_s3 + $0xbb0] sm:$0xff]  ;;  %v472_v21 = vld [vmem:[%s3314_s3 + $0x4a8] sm:$0xff] }
 0x128   :  { %976 = vmatprep.subr.mxu0 %v340_v22  ;;  %1047 = vmatprep.subr.mxu1 %v564_v23  ;;  %v696_v22 = vld [vmem:[%s3314_s3 + $0xba8] sm:$0xff]  ;;  %v466_v23 = vld [vmem:[%s3314_s3 + $0x478] sm:$0xff] }
 0x129   :  { %977 = vmatpush1.msra.mxu0 %v339_v24  ;;  %1048 = vmatpush1.msra.mxu1 %v563_v25  ;;  %v690_v24 = vld [vmem:[%s3314_s3 + $0xb78] sm:$0xff]  ;;  %v465_v25 = vld [vmem:[%s3314_s3 + $0x470] sm:$0xff] }
 0x12a   :  { %978 = vmatprep.subr.mxu0 %v333_v26  ;;  %1049 = vmatprep.subr.mxu1 %v557_v31  ;;  %v689_v26 = vld [vmem:[%s3314_s3 + $0xb70] sm:$0xff]  ;;  %v459_v31 = vld [vmem:[%s3314_s3 + $0x440] sm:$0xff] }
 0x12b   :  { %979 = vmatpush1.msra.mxu0 %v332_v32  ;;  %1050 = vmatpush1.msra.mxu1 %v556_v33  ;;  %v683_v32 = vld [vmem:[%s3314_s3 + $0xb40] sm:$0xff]  ;;  %v458_v33 = vld [vmem:[%s3314_s3 + $0x438] sm:$0xff] }
 0x12c   :  { %980 = vmatprep.subr.mxu0 %v326_v34  ;;  %1051 = vmatprep.subr.mxu1 %v550_v35  ;;  %v682_v34 = vld [vmem:[%s3314_s3 + $0xb38] sm:$0xff]  ;;  %v452_v35 = vld [vmem:[%s3314_s3 + $0x408] sm:$0xff] }
 0x12d   :  { %981 = vmatpush1.msra.mxu0 %v325_v36  ;;  %1052 = vmatpush1.msra.mxu1 %v549_v37  ;;  %v676_v36 = vld [vmem:[%s3314_s3 + $0xb08] sm:$0xff]  ;;  %v451_v37 = vld [vmem:[%s3314_s3 + $0x400] sm:$0xff] }
 0x12e   :  { %982 = vmatprep.subr.mxu0 %v543_v38  ;;  %1053 = vmatprep.subr.mxu1 %v767_v39  ;;  %v675_v38 = vld [vmem:[%s3314_s3 + $0xb00] sm:$0xff]  ;;  %v445_v39 = vld [vmem:[%s3314_s3 + $0x3d0] sm:$0xff] }
 0x12f   :  { %983 = vmatpush2.msra.mxu0 %v542_v40  ;;  %1054 = vmatpush2.msra.mxu1 %v766_v41  ;;  %v669_v40 = vld [vmem:[%s3314_s3 + $0xad0] sm:$0xff]  ;;  %v444_v41 = vld [vmem:[%s3314_s3 + $0x3c8] sm:$0xff] }
 0x130   :  { %984 = vmatprep.subr.mxu0 %v536_v42  ;;  %1055 = vmatprep.subr.mxu1 %v760_v43  ;;  %v668_v42 = vld [vmem:[%s3314_s3 + $0xac8] sm:$0xff]  ;;  %v438_v43 = vld [vmem:[%s3314_s3 + $0x398] sm:$0xff] }
 0x131   :  { %985 = vmatpush2.msra.mxu0 %v535_v44  ;;  %1056 = vmatpush2.msra.mxu1 %v759_v45  ;;  %v662_v44 = vld [vmem:[%s3314_s3 + $0xa98] sm:$0xff]  ;;  %v437_v45 = vld [vmem:[%s3314_s3 + $0x390] sm:$0xff] }
 0x132   :  { %986 = vmatprep.subr.mxu0 %v529_v46  ;;  %1057 = vmatprep.subr.mxu1 %v753_v47  ;;  %v661_v46 = vld [vmem:[%s3314_s3 + $0xa90] sm:$0xff] }
 0x133   :  { %987 = vmatpush2.msra.mxu0 %v528_v48  ;;  %1058 = vmatpush2.msra.mxu1 %v752_v49  ;;  %v433_v47 = vld [vmem:[%s3314_s3 + $0x370] sm:$0xff]  ;;  %v432_v49 = vld [vmem:[%s3314_s3 + $0x368] sm:$0xff] }
 0x134   :  { %988 = vmatprep.subr.mxu0 %v522_v50  ;;  %1059 = vmatprep.subr.mxu1 %v746_v51  ;;  %v657_v48 = vld [vmem:[%s3314_s3 + $0xa70] sm:$0xff]  ;;  %v656_v50 = vld [vmem:[%s3314_s3 + $0xa68] sm:$0xff]  ;;  %v426_v51 = vld [vmem:[%s3314_s3 + $0x338] sm:$0xff] }
 0x135   :  { %989 = vmatpush2.msra.mxu0 %v521_v52  ;;  %1060 = vmatpush2.msra.mxu1 %v745_v53  ;;  %v650_v52 = vld [vmem:[%s3314_s3 + $0xa38] sm:$0xff]  ;;  %v425_v53 = vld [vmem:[%s3314_s3 + $0x330] sm:$0xff] }
 0x136   :  { %990 = vmatprep.subr.mxu0 %v515_v54  ;;  %1061 = vmatprep.subr.mxu1 %v739_v55  ;;  %v649_v54 = vld [vmem:[%s3314_s3 + $0xa30] sm:$0xff]  ;;  %v419_v55 = vld [vmem:[%s3314_s3 + $0x300] sm:$0xff] }
 0x137   :  { %991 = vmatpush2.msra.mxu0 %v514_v56  ;;  %1062 = vmatpush2.msra.mxu1 %v738_v57  ;;  %v643_v56 = vld [vmem:[%s3314_s3 + $0xa00] sm:$0xff]  ;;  %v418_v57 = vld [vmem:[%s3314_s3 + $0x2f8] sm:$0xff] }
 0x138   :  { %992 = vmatprep.subr.mxu0 %v508_v58  ;;  %1063 = vmatprep.subr.mxu1 %v732_v59  ;;  %v642_v58 = vld [vmem:[%s3314_s3 + $0x9f8] sm:$0xff]  ;;  %v412_v59 = vld [vmem:[%s3314_s3 + $0x2c8] sm:$0xff] }
 0x139   :  { %993 = vmatpush2.msra.mxu0 %v507_v60  ;;  %1064 = vmatpush2.msra.mxu1 %v731_v61  ;;  %v636_v60 = vld [vmem:[%s3314_s3 + $0x9c8] sm:$0xff]  ;;  %v411_v61 = vld [vmem:[%s3314_s3 + $0x2c0] sm:$0xff] }
 0x13a   :  { %994 = vmatprep.subr.mxu0 %v501_v62  ;;  %1065 = vmatprep.subr.mxu1 %v725_v63  ;;  %v635_v62 = vld [vmem:[%s3314_s3 + $0x9c0] sm:$0xff]  ;;  %v405_v63 = vld [vmem:[%s3314_s3 + $0x290] sm:$0xff] }
 0x13b   :  { %995 = vmatpush2.msra.mxu0 %v500_v0  ;;  %1066 = vmatpush2.msra.mxu1 %v724_v1  ;;  %v629_v0 = vld [vmem:[%s3314_s3 + $0x990] sm:$0xff]  ;;  %v404_v1 = vld [vmem:[%s3314_s3 + $0x288] sm:$0xff] }
 0x13c   :  { %996 = vmatprep.subr.mxu0 %v494_v2  ;;  %1067 = vmatprep.subr.mxu1 %v718_v3  ;;  %v628_v2 = vld [vmem:[%s3314_s3 + $0x988] sm:$0xff]  ;;  %v398_v3 = vld [vmem:[%s3314_s3 + $0x258] sm:$0xff] }
 0x13d   :  { %997 = vmatpush2.msra.mxu0 %v493_v4  ;;  %1068 = vmatpush2.msra.mxu1 %v717_v8  ;;  %v622_v4 = vld [vmem:[%s3314_s3 + $0x958] sm:$0xff]  ;;  %v397_v8 = vld [vmem:[%s3314_s3 + $0x250] sm:$0xff] }
 0x13e   :  { %998 = vmatprep.subr.mxu0 %v487_v11  ;;  %1069 = vmatprep.subr.mxu1 %v711_v12  ;;  %v621_v11 = vld [vmem:[%s3314_s3 + $0x950] sm:$0xff]  ;;  %v391_v12 = vld [vmem:[%s3314_s3 + $0x220] sm:$0xff] }
 0x13f   :  { %999 = vmatpush2.msra.mxu0 %v486_v13  ;;  %1070 = vmatpush2.msra.mxu1 %v710_v14  ;;  %v615_v13 = vld [vmem:[%s3314_s3 + $0x920] sm:$0xff]  ;;  %v390_v14 = vld [vmem:[%s3314_s3 + $0x218] sm:$0xff] }
 0x140   :  { %1000 = vmatprep.subr.mxu0 %v480_v15  ;;  %1071 = vmatprep.subr.mxu1 %v704_v16  ;;  %v614_v15 = vld [vmem:[%s3314_s3 + $0x918] sm:$0xff]  ;;  %v384_v16 = vld [vmem:[%s3314_s3 + $0x1e8] sm:$0xff] }
 0x141   :  { %1001 = vmatpush2.msra.mxu0 %v479_v17  ;;  %1072 = vmatpush2.msra.mxu1 %v703_v18  ;;  %v608_v17 = vld [vmem:[%s3314_s3 + $0x8e8] sm:$0xff]  ;;  %v383_v18 = vld [vmem:[%s3314_s3 + $0x1e0] sm:$0xff] }
 0x142   :  { %1002 = vmatprep.subr.mxu0 %v473_v19  ;;  %1073 = vmatprep.subr.mxu1 %v697_v20  ;;  %v607_v19 = vld [vmem:[%s3314_s3 + $0x8e0] sm:$0xff]  ;;  %v377_v20 = vld [vmem:[%s3314_s3 + $0x1b0] sm:$0xff] }
 0x143   :  { %1003 = vmatpush2.msra.mxu0 %v472_v21  ;;  %1074 = vmatpush2.msra.mxu1 %v696_v22  ;;  %v601_v21 = vld [vmem:[%s3314_s3 + $0x8b0] sm:$0xff]  ;;  %v376_v22 = vld [vmem:[%s3314_s3 + $0x1a8] sm:$0xff] }
 0x144   :  { %1004 = vmatprep.subr.mxu0 %v466_v23  ;;  %1075 = vmatprep.subr.mxu1 %v690_v24  ;;  %v600_v23 = vld [vmem:[%s3314_s3 + $0x8a8] sm:$0xff]  ;;  %v370_v24 = vld [vmem:[%s3314_s3 + $0x178] sm:$0xff] }
 0x145   :  { %1005 = vmatpush2.msra.mxu0 %v465_v25  ;;  %1076 = vmatpush2.msra.mxu1 %v689_v26  ;;  %v594_v25 = vld [vmem:[%s3314_s3 + $0x878] sm:$0xff]  ;;  %v369_v26 = vld [vmem:[%s3314_s3 + $0x170] sm:$0xff] }
 0x146   :  { %1006 = vmatprep.subr.mxu0 %v459_v31  ;;  %1077 = vmatprep.subr.mxu1 %v683_v32  ;;  %v593_v31 = vld [vmem:[%s3314_s3 + $0x870] sm:$0xff]  ;;  %v363_v32 = vld [vmem:[%s3314_s3 + $0x140] sm:$0xff] }
 0x147   :  { %1007 = vmatpush2.msra.mxu0 %v458_v33  ;;  %1078 = vmatpush2.msra.mxu1 %v682_v34  ;;  %v587_v33 = vld [vmem:[%s3314_s3 + $0x840] sm:$0xff]  ;;  %v362_v34 = vld [vmem:[%s3314_s3 + $0x138] sm:$0xff] }
 0x148   :  { %1008 = vmatprep.subr.mxu0 %v452_v35  ;;  %1079 = vmatprep.subr.mxu1 %v676_v36  ;;  %v586_v35 = vld [vmem:[%s3314_s3 + $0x838] sm:$0xff]  ;;  %v356_v36 = vld [vmem:[%s3314_s3 + $0x108] sm:$0xff] }
 0x149   :  { %1009 = vmatpush2.msra.mxu0 %v451_v37  ;;  %1080 = vmatpush2.msra.mxu1 %v675_v38  ;;  %v580_v37 = vld [vmem:[%s3314_s3 + $0x808] sm:$0xff]  ;;  %v355_v38 = vld [vmem:[%s3314_s3 + $0x100] sm:$0xff] }
 0x14a   :  { %1010 = vmatprep.subr.mxu0 %v445_v39  ;;  %1081 = vmatprep.subr.mxu1 %v669_v40  ;;  %v579_v39 = vld [vmem:[%s3314_s3 + $0x800] sm:$0xff]  ;;  %v349_v40 = vld [vmem:[%s3314_s3 + $0xd0] sm:$0xff] }
 0x14b   :  { %1011 = vmatpush2.msra.mxu0 %v444_v41  ;;  %1082 = vmatpush2.msra.mxu1 %v668_v42  ;;  %v573_v41 = vld [vmem:[%s3314_s3 + $0x7d0] sm:$0xff]  ;;  %v348_v42 = vld [vmem:[%s3314_s3 + $0xc8] sm:$0xff] }
 0x14c   :  { %1012 = vmatprep.subr.mxu0 %v438_v43  ;;  %1083 = vmatprep.subr.mxu1 %v662_v44  ;;  %v572_v43 = vld [vmem:[%s3314_s3 + $0x7c8] sm:$0xff]  ;;  %v342_v44 = vld [vmem:[%s3314_s3 + $0x98] sm:$0xff] }
 0x14d   :  { %1013 = vmatpush2.msra.mxu0 %v437_v45  ;;  %1084 = vmatpush2.msra.mxu1 %v661_v46  ;;  %v566_v45 = vld [vmem:[%s3314_s3 + $0x798] sm:$0xff]  ;;  %v341_v46 = vld [vmem:[%s3314_s3 + $0x90] sm:$0xff] }
 0x14e   :  { %1015 = vmatmul.mubr.f32.vlgmr.msra.gmra.mxu0 %v2320_v29  ;;  %1086 = vmatmul.mubr.f32.vlgmr.msra.gmra.mxu1 %v2322_v30 }
 0x14f   :  { %1092 = vmatprep.subr.mxu0 %v433_v47  ;;  %1163 = vmatprep.subr.mxu1 %v657_v48  ;;  %v565_v47 = vld [vmem:[%s3314_s3 + $0x790] sm:$0xff]  ;;  %v335_v48 = vld [vmem:[%s3314_s3 + $0x60] sm:$0xff] }
 0x150   :  { %1093 = vmatpush1.msra.mxu0 %v432_v49  ;;  %1156 = vmatprep.mubr.f32.mxu0 %v2316_v27  ;;  %v559_v49 = vld [vmem:[%s3314_s3 + $0x760] sm:$0xff] }
 0x151   :  { %1164 = vmatpush1.msra.mxu1 %v656_v50  ;;  %1227 = vmatprep.mubr.f32.mxu1 %v2318_v28  ;;  %v334_v50 = vld [vmem:[%s3314_s3 + $0x58] sm:$0xff] }
 0x152   :  { %1094 = vmatprep.subr.mxu0 %v426_v51  ;;  %1165 = vmatprep.subr.mxu1 %v650_v52  ;;  %v558_v51 = vld [vmem:[%s3314_s3 + $0x758] sm:$0xff]  ;;  %v328_v52 = vld [vmem:[%s3314_s3 + $0x28] sm:$0xff] }
 0x153   :  { %1095 = vmatpush1.msra.mxu0 %v425_v53  ;;  %1166 = vmatpush1.msra.mxu1 %v649_v54  ;;  %v552_v53 = vld [vmem:[%s3314_s3 + $0x728] sm:$0xff]  ;;  %v327_v54 = vld [vmem:[%s3314_s3 + $0x20] sm:$0xff] }
 0x154   :  { %1096 = vmatprep.subr.mxu0 %v419_v55  ;;  %1167 = vmatprep.subr.mxu1 %v643_v56  ;;  %v551_v55 = vld [vmem:[%s3314_s3 + $0x720] sm:$0xff]  ;;  %v545_v56 = vld [vmem:[%s3314_s3 + $0x6f0] sm:$0xff] }
 0x155   :  { %1097 = vmatpush1.msra.mxu0 %v418_v57  ;;  %1168 = vmatpush1.msra.mxu1 %v642_v58  ;;  %v769_v57 = vld [vmem:[%s3314_s3 + $0xdf0] sm:$0xff]  ;;  %v544_v58 = vld [vmem:[%s3314_s3 + $0x6e8] sm:$0xff] }
 0x156   :  { %1098 = vmatprep.subr.mxu0 %v412_v59  ;;  %1169 = vmatprep.subr.mxu1 %v636_v60  ;;  %v768_v59 = vld [vmem:[%s3314_s3 + $0xde8] sm:$0xff]  ;;  %v538_v60 = vld [vmem:[%s3314_s3 + $0x6b8] sm:$0xff] }
 0x157   :  { %1099 = vmatpush1.msra.mxu0 %v411_v61  ;;  %1170 = vmatpush1.msra.mxu1 %v635_v62  ;;  %v762_v61 = vld [vmem:[%s3314_s3 + $0xdb8] sm:$0xff]  ;;  %v537_v62 = vld [vmem:[%s3314_s3 + $0x6b0] sm:$0xff] }
 0x158   :  { %1100 = vmatprep.subr.mxu0 %v405_v63  ;;  %1171 = vmatprep.subr.mxu1 %v629_v0  ;;  %v761_v63 = vld [vmem:[%s3314_s3 + $0xdb0] sm:$0xff]  ;;  %v531_v0 = vld [vmem:[%s3314_s3 + $0x680] sm:$0xff] }
 0x159   :  { %1101 = vmatpush1.msra.mxu0 %v404_v1  ;;  %1172 = vmatpush1.msra.mxu1 %v628_v2  ;;  %v755_v1 = vld [vmem:[%s3314_s3 + $0xd80] sm:$0xff]  ;;  %v530_v2 = vld [vmem:[%s3314_s3 + $0x678] sm:$0xff] }
 0x15a   :  { %1102 = vmatprep.subr.mxu0 %v398_v3  ;;  %1173 = vmatprep.subr.mxu1 %v622_v4  ;;  %v754_v3 = vld [vmem:[%s3314_s3 + $0xd78] sm:$0xff]  ;;  %v524_v4 = vld [vmem:[%s3314_s3 + $0x648] sm:$0xff] }
 0x15b   :  { %1103 = vmatpush1.msra.mxu0 %v397_v8  ;;  %1174 = vmatpush1.msra.mxu1 %v621_v11  ;;  %v748_v8 = vld [vmem:[%s3314_s3 + $0xd48] sm:$0xff]  ;;  %v523_v11 = vld [vmem:[%s3314_s3 + $0x640] sm:$0xff] }
 0x15c   :  { %1104 = vmatprep.subr.mxu0 %v391_v12  ;;  %1175 = vmatprep.subr.mxu1 %v615_v13  ;;  %v747_v12 = vld [vmem:[%s3314_s3 + $0xd40] sm:$0xff]  ;;  %v517_v13 = vld [vmem:[%s3314_s3 + $0x610] sm:$0xff] }
 0x15d   :  { %1105 = vmatpush1.msra.mxu0 %v390_v14  ;;  %1176 = vmatpush1.msra.mxu1 %v614_v15  ;;  %v741_v14 = vld [vmem:[%s3314_s3 + $0xd10] sm:$0xff]  ;;  %v516_v15 = vld [vmem:[%s3314_s3 + $0x608] sm:$0xff] }
 0x15e   :  { %1106 = vmatprep.subr.mxu0 %v384_v16  ;;  %1177 = vmatprep.subr.mxu1 %v608_v17  ;;  %v740_v16 = vld [vmem:[%s3314_s3 + $0xd08] sm:$0xff]  ;;  %v510_v17 = vld [vmem:[%s3314_s3 + $0x5d8] sm:$0xff] }
 0x15f   :  { %1107 = vmatpush1.msra.mxu0 %v383_v18  ;;  %1178 = vmatpush1.msra.mxu1 %v607_v19  ;;  %v734_v18 = vld [vmem:[%s3314_s3 + $0xcd8] sm:$0xff]  ;;  %v509_v19 = vld [vmem:[%s3314_s3 + $0x5d0] sm:$0xff] }
 0x160   :  { %1108 = vmatprep.subr.mxu0 %v377_v20  ;;  %1179 = vmatprep.subr.mxu1 %v601_v21  ;;  %v733_v20 = vld [vmem:[%s3314_s3 + $0xcd0] sm:$0xff]  ;;  %v503_v21 = vld [vmem:[%s3314_s3 + $0x5a0] sm:$0xff] }
 0x161   :  { %1109 = vmatpush1.msra.mxu0 %v376_v22  ;;  %1180 = vmatpush1.msra.mxu1 %v600_v23  ;;  %v727_v22 = vld [vmem:[%s3314_s3 + $0xca0] sm:$0xff]  ;;  %v502_v23 = vld [vmem:[%s3314_s3 + $0x598] sm:$0xff] }
 0x162   :  { %1110 = vmatprep.subr.mxu0 %v370_v24  ;;  %1181 = vmatprep.subr.mxu1 %v594_v25  ;;  %v726_v24 = vld [vmem:[%s3314_s3 + $0xc98] sm:$0xff]  ;;  %v496_v25 = vld [vmem:[%s3314_s3 + $0x568] sm:$0xff] }
 0x163   :  { %1111 = vmatpush1.msra.mxu0 %v369_v26  ;;  %1182 = vmatpush1.msra.mxu1 %v593_v31  ;;  %v720_v26 = vld [vmem:[%s3314_s3 + $0xc68] sm:$0xff]  ;;  %v495_v31 = vld [vmem:[%s3314_s3 + $0x560] sm:$0xff] }
 0x164   :  { %1112 = vmatprep.subr.mxu0 %v363_v32  ;;  %1183 = vmatprep.subr.mxu1 %v587_v33  ;;  %v719_v32 = vld [vmem:[%s3314_s3 + $0xc60] sm:$0xff]  ;;  %v489_v33 = vld [vmem:[%s3314_s3 + $0x530] sm:$0xff] }
 0x165   :  { %1113 = vmatpush1.msra.mxu0 %v362_v34  ;;  %1184 = vmatpush1.msra.mxu1 %v586_v35  ;;  %v713_v34 = vld [vmem:[%s3314_s3 + $0xc30] sm:$0xff]  ;;  %v488_v35 = vld [vmem:[%s3314_s3 + $0x528] sm:$0xff] }
 0x166   :  { %1114 = vmatprep.subr.mxu0 %v356_v36  ;;  %1185 = vmatprep.subr.mxu1 %v580_v37  ;;  %v712_v36 = vld [vmem:[%s3314_s3 + $0xc28] sm:$0xff]  ;;  %v482_v37 = vld [vmem:[%s3314_s3 + $0x4f8] sm:$0xff] }
 0x167   :  { %1115 = vmatpush1.msra.mxu0 %v355_v38  ;;  %1186 = vmatpush1.msra.mxu1 %v579_v39  ;;  %v706_v38 = vld [vmem:[%s3314_s3 + $0xbf8] sm:$0xff]  ;;  %v481_v39 = vld [vmem:[%s3314_s3 + $0x4f0] sm:$0xff] }
 0x168   :  { %1116 = vmatprep.subr.mxu0 %v349_v40  ;;  %1187 = vmatprep.subr.mxu1 %v573_v41  ;;  %v705_v40 = vld [vmem:[%s3314_s3 + $0xbf0] sm:$0xff]  ;;  %v475_v41 = vld [vmem:[%s3314_s3 + $0x4c0] sm:$0xff] }
 0x169   :  { %1117 = vmatpush1.msra.mxu0 %v348_v42  ;;  %1188 = vmatpush1.msra.mxu1 %v572_v43  ;;  %v699_v42 = vld [vmem:[%s3314_s3 + $0xbc0] sm:$0xff]  ;;  %v474_v43 = vld [vmem:[%s3314_s3 + $0x4b8] sm:$0xff] }
 0x16a   :  { %1118 = vmatprep.subr.mxu0 %v342_v44  ;;  %1189 = vmatprep.subr.mxu1 %v566_v45  ;;  %v698_v44 = vld [vmem:[%s3314_s3 + $0xbb8] sm:$0xff]  ;;  %v468_v45 = vld [vmem:[%s3314_s3 + $0x488] sm:$0xff] }
 0x16b   :  { %1119 = vmatpush1.msra.mxu0 %v341_v46  ;;  %1190 = vmatpush1.msra.mxu1 %v565_v47  ;;  %v692_v46 = vld [vmem:[%s3314_s3 + $0xb88] sm:$0xff]  ;;  %v467_v47 = vld [vmem:[%s3314_s3 + $0x480] sm:$0xff] }
 0x16c   :  { %1120 = vmatprep.subr.mxu0 %v335_v48  ;;  %1191 = vmatprep.subr.mxu1 %v559_v49  ;;  %v691_v48 = vld [vmem:[%s3314_s3 + $0xb80] sm:$0xff]  ;;  %v461_v49 = vld [vmem:[%s3314_s3 + $0x450] sm:$0xff] }
 0x16d   :  { %1121 = vmatpush1.msra.mxu0 %v334_v50  ;;  %1192 = vmatpush1.msra.mxu1 %v558_v51  ;;  %v685_v50 = vld [vmem:[%s3314_s3 + $0xb50] sm:$0xff]  ;;  %v460_v51 = vld [vmem:[%s3314_s3 + $0x448] sm:$0xff] }
 0x16e   :  { %1122 = vmatprep.subr.mxu0 %v328_v52  ;;  %1193 = vmatprep.subr.mxu1 %v552_v53  ;;  %v684_v52 = vld [vmem:[%s3314_s3 + $0xb48] sm:$0xff]  ;;  %v454_v53 = vld [vmem:[%s3314_s3 + $0x418] sm:$0xff] }
 0x16f   :  { %1123 = vmatpush1.msra.mxu0 %v327_v54  ;;  %1194 = vmatpush1.msra.mxu1 %v551_v55  ;;  %v678_v54 = vld [vmem:[%s3314_s3 + $0xb18] sm:$0xff]  ;;  %v453_v55 = vld [vmem:[%s3314_s3 + $0x410] sm:$0xff] }
 0x170   :  { %1124 = vmatprep.subr.mxu0 %v545_v56  ;;  %1195 = vmatprep.subr.mxu1 %v769_v57  ;;  %v677_v56 = vld [vmem:[%s3314_s3 + $0xb10] sm:$0xff]  ;;  %v447_v57 = vld [vmem:[%s3314_s3 + $0x3e0] sm:$0xff] }
 0x171   :  { %1125 = vmatpush2.msra.mxu0 %v544_v58  ;;  %1196 = vmatpush2.msra.mxu1 %v768_v59  ;;  %v671_v58 = vld [vmem:[%s3314_s3 + $0xae0] sm:$0xff]  ;;  %v446_v59 = vld [vmem:[%s3314_s3 + $0x3d8] sm:$0xff] }
 0x172   :  { %1126 = vmatprep.subr.mxu0 %v538_v60  ;;  %1197 = vmatprep.subr.mxu1 %v762_v61  ;;  %v670_v60 = vld [vmem:[%s3314_s3 + $0xad8] sm:$0xff]  ;;  %v440_v61 = vld [vmem:[%s3314_s3 + $0x3a8] sm:$0xff] }
 0x173   :  { %1127 = vmatpush2.msra.mxu0 %v537_v62  ;;  %1198 = vmatpush2.msra.mxu1 %v761_v63  ;;  %v664_v62 = vld [vmem:[%s3314_s3 + $0xaa8] sm:$0xff]  ;;  %v439_v63 = vld [vmem:[%s3314_s3 + $0x3a0] sm:$0xff] }
 0x174   :  { %1128 = vmatprep.subr.mxu0 %v531_v0  ;;  %1199 = vmatprep.subr.mxu1 %v755_v1  ;;  %v663_v0 = vld [vmem:[%s3314_s3 + $0xaa0] sm:$0xff]  ;;  %v546_v1 = vld [vmem:[%s3314_s3 + $0x6f8] sm:$0xff] }
 0x175   :  { %1129 = vmatpush2.msra.mxu0 %v530_v2  ;;  %1200 = vmatpush2.msra.mxu1 %v754_v3  ;;  %v770_v2 = vld [vmem:[%s3314_s3 + $0xdf8] sm:$0xff] }
 0x176   :  { %1130 = vmatprep.subr.mxu0 %v524_v4  ;;  %1201 = vmatprep.subr.mxu1 %v748_v8  ;;  %v434_v3 = vld [vmem:[%s3314_s3 + $0x378] sm:$0xff]  ;;  %v539_v8 = vld [vmem:[%s3314_s3 + $0x6c0] sm:$0xff] }
 0x177   :  { %1131 = vmatpush2.msra.mxu0 %v523_v11  ;;  %1202 = vmatpush2.msra.mxu1 %v747_v12  ;;  %v658_v4 = vld [vmem:[%s3314_s3 + $0xa78] sm:$0xff]  ;;  %v763_v11 = vld [vmem:[%s3314_s3 + $0xdc0] sm:$0xff] }
 0x178   :  { %1132 = vmatprep.subr.mxu0 %v517_v13  ;;  %1203 = vmatprep.subr.mxu1 %v741_v14  ;;  %v427_v12 = vld [vmem:[%s3314_s3 + $0x340] sm:$0xff]  ;;  %v532_v14 = vld [vmem:[%s3314_s3 + $0x688] sm:$0xff] }
 0x179   :  { %1133 = vmatpush2.msra.mxu0 %v516_v15  ;;  %1204 = vmatpush2.msra.mxu1 %v740_v16  ;;  %v651_v13 = vld [vmem:[%s3314_s3 + $0xa40] sm:$0xff]  ;;  %v756_v15 = vld [vmem:[%s3314_s3 + $0xd88] sm:$0xff] }
 0x17a   :  { %1134 = vmatprep.subr.mxu0 %v510_v17  ;;  %1205 = vmatprep.subr.mxu1 %v734_v18  ;;  %v644_v16 = vld [vmem:[%s3314_s3 + $0xa08] sm:$0xff]  ;;  %v749_v17 = vld [vmem:[%s3314_s3 + $0xd50] sm:$0xff] }
 0x17b   :  { %1135 = vmatpush2.msra.mxu0 %v509_v19  ;;  %1206 = vmatpush2.msra.mxu1 %v733_v20  ;;  %v413_v18 = vld [vmem:[%s3314_s3 + $0x2d0] sm:$0xff]  ;;  %v518_v20 = vld [vmem:[%s3314_s3 + $0x618] sm:$0xff] }
 0x17c   :  { %1136 = vmatprep.subr.mxu0 %v503_v21  ;;  %1207 = vmatprep.subr.mxu1 %v727_v22  ;;  %v637_v19 = vld [vmem:[%s3314_s3 + $0x9d0] sm:$0xff]  ;;  %v742_v21 = vld [vmem:[%s3314_s3 + $0xd18] sm:$0xff] }
 0x17d   :  { %1137 = vmatpush2.msra.mxu0 %v502_v23  ;;  %1208 = vmatpush2.msra.mxu1 %v726_v24  ;;  %v406_v22 = vld [vmem:[%s3314_s3 + $0x298] sm:$0xff]  ;;  %v511_v24 = vld [vmem:[%s3314_s3 + $0x5e0] sm:$0xff] }
 0x17e   :  { %1138 = vmatprep.subr.mxu0 %v496_v25  ;;  %1209 = vmatprep.subr.mxu1 %v720_v26  ;;  %v630_v23 = vld [vmem:[%s3314_s3 + $0x998] sm:$0xff]  ;;  %v735_v25 = vld [vmem:[%s3314_s3 + $0xce0] sm:$0xff] }
 0x17f   :  { %1139 = vmatpush2.msra.mxu0 %v495_v31  ;;  %1210 = vmatpush2.msra.mxu1 %v719_v32  ;;  %v399_v26 = vld [vmem:[%s3314_s3 + $0x260] sm:$0xff]  ;;  %v504_v32 = vld [vmem:[%s3314_s3 + $0x5a8] sm:$0xff] }
 0x180   :  { %1140 = vmatprep.subr.mxu0 %v489_v33  ;;  %1211 = vmatprep.subr.mxu1 %v713_v34  ;;  %v623_v31 = vld [vmem:[%s3314_s3 + $0x960] sm:$0xff]  ;;  %v728_v33 = vld [vmem:[%s3314_s3 + $0xca8] sm:$0xff] }
 0x181   :  { %1141 = vmatpush2.msra.mxu0 %v488_v35  ;;  %1212 = vmatpush2.msra.mxu1 %v712_v36  ;;  %v392_v34 = vld [vmem:[%s3314_s3 + $0x228] sm:$0xff]  ;;  %v497_v36 = vld [vmem:[%s3314_s3 + $0x570] sm:$0xff] }
 0x182   :  { %1142 = vmatprep.subr.mxu0 %v482_v37  ;;  %1213 = vmatprep.subr.mxu1 %v706_v38  ;;  %v616_v35 = vld [vmem:[%s3314_s3 + $0x928] sm:$0xff]  ;;  %v721_v37 = vld [vmem:[%s3314_s3 + $0xc70] sm:$0xff] }
 0x183   :  { %1143 = vmatpush2.msra.mxu0 %v481_v39  ;;  %1214 = vmatpush2.msra.mxu1 %v705_v40  ;;  %v385_v38 = vld [vmem:[%s3314_s3 + $0x1f0] sm:$0xff]  ;;  %v490_v40 = vld [vmem:[%s3314_s3 + $0x538] sm:$0xff] }
 0x184   :  { %1144 = vmatprep.subr.mxu0 %v475_v41  ;;  %1215 = vmatprep.subr.mxu1 %v699_v42  ;;  %v609_v39 = vld [vmem:[%s3314_s3 + $0x8f0] sm:$0xff]  ;;  %v714_v41 = vld [vmem:[%s3314_s3 + $0xc38] sm:$0xff] }
 0x185   :  { %1145 = vmatpush2.msra.mxu0 %v474_v43  ;;  %1216 = vmatpush2.msra.mxu1 %v698_v44  ;;  %v378_v42 = vld [vmem:[%s3314_s3 + $0x1b8] sm:$0xff]  ;;  %v483_v44 = vld [vmem:[%s3314_s3 + $0x500] sm:$0xff] }
 0x186   :  { %1146 = vmatprep.subr.mxu0 %v468_v45  ;;  %1217 = vmatprep.subr.mxu1 %v692_v46  ;;  %v602_v43 = vld [vmem:[%s3314_s3 + $0x8b8] sm:$0xff]  ;;  %v707_v45 = vld [vmem:[%s3314_s3 + $0xc00] sm:$0xff] }
 0x187   :  { %1147 = vmatpush2.msra.mxu0 %v467_v47  ;;  %1218 = vmatpush2.msra.mxu1 %v691_v48  ;;  %v371_v46 = vld [vmem:[%s3314_s3 + $0x180] sm:$0xff]  ;;  %v476_v48 = vld [vmem:[%s3314_s3 + $0x4c8] sm:$0xff] }
 0x188   :  { %1148 = vmatprep.subr.mxu0 %v461_v49  ;;  %1219 = vmatprep.subr.mxu1 %v685_v50  ;;  %v595_v47 = vld [vmem:[%s3314_s3 + $0x880] sm:$0xff]  ;;  %v700_v49 = vld [vmem:[%s3314_s3 + $0xbc8] sm:$0xff] }
 0x189   :  { %1149 = vmatpush2.msra.mxu0 %v460_v51  ;;  %1220 = vmatpush2.msra.mxu1 %v684_v52  ;;  %v364_v50 = vld [vmem:[%s3314_s3 + $0x148] sm:$0xff]  ;;  %v469_v52 = vld [vmem:[%s3314_s3 + $0x490] sm:$0xff] }
 0x18a   :  { %1150 = vmatprep.subr.mxu0 %v454_v53  ;;  %1221 = vmatprep.subr.mxu1 %v678_v54  ;;  %v588_v51 = vld [vmem:[%s3314_s3 + $0x848] sm:$0xff]  ;;  %v693_v53 = vld [vmem:[%s3314_s3 + $0xb90] sm:$0xff] }
 0x18b   :  { %1151 = vmatpush2.msra.mxu0 %v453_v55  ;;  %1222 = vmatpush2.msra.mxu1 %v677_v56  ;;  %v357_v54 = vld [vmem:[%s3314_s3 + $0x110] sm:$0xff]  ;;  %v462_v56 = vld [vmem:[%s3314_s3 + $0x458] sm:$0xff] }
 0x18c   :  { %1152 = vmatprep.subr.mxu0 %v447_v57  ;;  %1223 = vmatprep.subr.mxu1 %v671_v58  ;;  %v581_v55 = vld [vmem:[%s3314_s3 + $0x810] sm:$0xff]  ;;  %v686_v57 = vld [vmem:[%s3314_s3 + $0xb58] sm:$0xff] }
 0x18d   :  { %1153 = vmatpush2.msra.mxu0 %v446_v59  ;;  %1224 = vmatpush2.msra.mxu1 %v670_v60  ;;  %v350_v58 = vld [vmem:[%s3314_s3 + $0xd8] sm:$0xff]  ;;  %v455_v60 = vld [vmem:[%s3314_s3 + $0x420] sm:$0xff] }
 0x18e   :  { %1154 = vmatprep.subr.mxu0 %v440_v61  ;;  %1225 = vmatprep.subr.mxu1 %v664_v62  ;;  %v574_v59 = vld [vmem:[%s3314_s3 + $0x7d8] sm:$0xff]  ;;  %v679_v61 = vld [vmem:[%s3314_s3 + $0xb20] sm:$0xff] }
 0x18f   :  { %1155 = vmatpush2.msra.mxu0 %v439_v63  ;;  %1226 = vmatpush2.msra.mxu1 %v663_v0  ;;  %v343_v62 = vld [vmem:[%s3314_s3 + $0xa0] sm:$0xff]  ;;  %v448_v0 = vld [vmem:[%s3314_s3 + $0x3e8] sm:$0xff] }
 0x190   :  { %1157 = vmatmul.mubr.f32.vlgmr.msra.gmra.mxu0 %v2320_v29  ;;  %1228 = vmatmul.mubr.f32.vlgmr.msra.gmra.mxu1 %v2322_v30  ;;  %v567_v63 = vld [vmem:[%s3314_s3 + $0x7a0] sm:$0xff] }
 0x191   :  { %1395 = vmatprep.subr.mxu0 %v546_v1  ;;  %1430 = vmatprep.subr.mxu1 %v770_v2  ;;  %v672_v1 = vld [vmem:[%s3314_s3 + $0xae8] sm:$0xff] }
 0x192   :  { %1396 = vmatpush3.msra.mxu0 %v434_v3  ;;  %1298 = vmatprep.mubr.f32.mxu0 %v2316_v27  ;;  %v420_v27 = vld [vmem:[%s3314_s3 + $0x308] sm:$0xff] }
 0x193   :  { %1431 = vmatpush3.msra.mxu1 %v658_v4  ;;  %1368 = vmatprep.mubr.f32.mxu1 %v2318_v28  ;;  %v525_v28 = vld [vmem:[%s3314_s3 + $0x650] sm:$0xff]  ;;  %v336_v2 = vld [vmem:[%s3314_s3 + $0x68] sm:$0xff] }
 0x194   :  { %1397 = vmatprep.subr.mxu0 %v539_v8  ;;  %1432 = vmatprep.subr.mxu1 %v763_v11  ;;  %v560_v3 = vld [vmem:[%s3314_s3 + $0x768] sm:$0xff]  ;;  %v441_v4 = vld [vmem:[%s3314_s3 + $0x3b0] sm:$0xff] }
 0x195   :  { %1398 = vmatpush3.msra.mxu0 %v427_v12  ;;  %1433 = vmatpush3.msra.mxu1 %v651_v13  ;;  %v665_v8 = vld [vmem:[%s3314_s3 + $0xab0] sm:$0xff]  ;;  %v771_v13 = vld [vmem:[%s3315_s4] sm:$0xff] }
 0x196   :  { %1399 = vmatprep.subr.mxu0 %v532_v14  ;;  %1434 = vmatprep.subr.mxu1 %v756_v15  ;;  %v329_v11 = vld [vmem:[%s3314_s3 + $0x30] sm:$0xff]  ;;  %v776_v14 = vrot.slane %v771_v13, %v155_v6  ;;  %v780_v15 = vrot.slane %v771_v13, %v159_v9 }
 0x197   :  { %1400 = vmatpush3.msra.mxu0 %v420_v27  ;;  %1435 = vmatpush3.msra.mxu1 %v644_v16  ;;  %v553_v12 = vld [vmem:[%s3314_s3 + $0x730] sm:$0xff]  ;;  %s1488_s3 = smov [#allocation2]  }
 0x198   :  { %1401 = vmatprep.subr.mxu0 %v525_v28  ;;  %1436 = vmatprep.subr.mxu1 %v749_v17  ;;  %s1387_s4 = sshll.u32 %s1488_s3, 4  ;;  %s1388_s4 = int_to_ptr.vmem [resolvable:$true] %s1387_s4 }
 0x199   :  { %1402 = vmatpush3.msra.mxu0 %v413_v18  ;;  %1437 = vmatpush3.msra.mxu1 %v637_v19  ;;  %s1466_s14 = scalar_lea.vmem %s1388_s4, 896  ;;  %p1471_p1 = scmp.lt.s32.totalorder %s1388_s4, %s1388_s4 }
 0x19a   :  { %1403 = vmatprep.subr.mxu0 %v518_v20  ;;  %1438 = vmatprep.subr.mxu1 %v742_v21  ;;  %v788_v21 = vrot.slane %v771_v13, %v167_v10  ;;  %p1467_p0 = scmp.ne.s32.totalorder %s1388_s4, %s1466_s14  ;;  %p1472_p2 = scmp.lt.s32.totalorder %s1466_s14, %s1466_s14 }
 0x19b   :  { %1404 = vmatpush3.msra.mxu0 %v406_v22  ;;  %1439 = vmatpush3.msra.mxu1 %v630_v23 }
 0x19c   :  { %1405 = vmatprep.subr.mxu0 %v511_v24  ;;  %1440 = vmatprep.subr.mxu1 %v735_v25  ;;  %p1473_p3 = por %p1472_p2, %p1471_p1 }
 0x19d   :  { %1406 = vmatpush3.msra.mxu0 %v399_v26  ;;  %1441 = vmatpush3.msra.mxu1 %v623_v31 }
 0x19e   :  { %1407 = vmatprep.subr.mxu0 %v504_v32  ;;  %1442 = vmatprep.subr.mxu1 %v728_v33  ;;  %v791_v32 = vsub.s32 4, %v2299_v5  ;;  %v795_v33 = vsub.s32 5, %v2299_v5  ;;  %p1474_p4 = pnand %p1473_p3, %p1467_p0 }
 0x19f   :  { %1408 = vmatpush3.msra.mxu0 %v392_v34  ;;  %1443 = vmatpush3.msra.mxu1 %v616_v35 }
 0x1a0   :  { %1409 = vmatprep.subr.mxu0 %v497_v36  ;;  %1444 = vmatprep.subr.mxu1 %v721_v37  ;;  %v792_v34 = vrot.slane %v771_v13, %v791_v32  ;;  %v796_v35 = vrot.slane %v771_v13, %v795_v33 }
 0x1a1   :  { %1410 = vmatpush3.msra.mxu0 %v385_v38  ;;  %1445 = vmatpush3.msra.mxu1 %v609_v39 }
 0x1a2   :  { %1411 = vmatprep.subr.mxu0 %v490_v40  ;;  %1446 = vmatprep.subr.mxu1 %v714_v41 }
 0x1a3   :  { %1412 = vmatpush3.msra.mxu0 %v378_v42  ;;  %1447 = vmatpush3.msra.mxu1 %v602_v43  ;;  %v799_v42 = vsub.s32 6, %v2299_v5 }
 0x1a4   :  { %1413 = vmatprep.subr.mxu0 %v483_v44  ;;  %1448 = vmatprep.subr.mxu1 %v707_v45 }
 0x1a5   :  { %1414 = vmatpush3.msra.mxu0 %v371_v46  ;;  %1449 = vmatpush3.msra.mxu1 %v595_v47  ;;  %v800_v45 = vrot.slane %v771_v13, %v799_v42 }
 0x1a6   :  { %1415 = vmatprep.subr.mxu0 %v476_v48  ;;  %1450 = vmatprep.subr.mxu1 %v700_v49 }
 0x1a7   :  { %1416 = vmatpush3.msra.mxu0 %v364_v50  ;;  %1451 = vmatpush3.msra.mxu1 %v588_v51 }
 0x1a8   :  { %1417 = vmatprep.subr.mxu0 %v469_v52  ;;  %1452 = vmatprep.subr.mxu1 %v693_v53 }
 0x1a9   :  { %1418 = vmatpush3.msra.mxu0 %v357_v54  ;;  %1453 = vmatpush3.msra.mxu1 %v581_v55 }
 0x1aa   :  { %1419 = vmatprep.subr.mxu0 %v462_v56  ;;  %1454 = vmatprep.subr.mxu1 %v686_v57 }
 0x1ab   :  { %1420 = vmatpush3.msra.mxu0 %v350_v58  ;;  %1455 = vmatpush3.msra.mxu1 %v574_v59 }
 0x1ac   :  { %1421 = vmatprep.subr.mxu0 %v455_v60  ;;  %1456 = vmatprep.subr.mxu1 %v679_v61 }
 0x1ad   :  { %1422 = vmatpush3.msra.mxu0 %v343_v62  ;;  %1457 = vmatpush3.msra.mxu1 %v567_v63 }
 0x1ae   :  { %1423 = vmatprep.subr.mxu0 %v448_v0  ;;  %1458 = vmatprep.subr.mxu1 %v672_v1 }
 0x1af   :  { %1424 = vmatpush3.msra.mxu0 %v336_v2  ;;  %1459 = vmatpush3.msra.mxu1 %v560_v3 }
 0x1b0   :  { %1425 = vmatprep.subr.mxu0 %v441_v4  ;;  %1460 = vmatprep.subr.mxu1 %v665_v8 }
 0x1b1   :  { %1426 = vmatpush3.msra.mxu0 %v329_v11  ;;  %1461 = vmatpush3.msra.mxu1 %v553_v12 }
 0x1b2   :  { %1299 = vmatmul.mubr.f32.vlgmr.msra.gmra.mxu0 %v2320_v29  ;;  %1369 = vmatmul.mubr.f32.vlgmr.msra.gmra.mxu1 %v2322_v30  ;;  %v784_v30 = vrot.slane %v771_v13, %v163_v7 }
 0x1cd   :  { %v874_v27 = vpop.f32.mrf.mxu0  ;;  %v945_v16 = vpop.f32.mrf.mxu1 }
 0x1ce   :  { %v875_v28 = vadd.f32 %v874_v27, %v776_v14 }
 0x1cf   :  { %v876_v17 = vpop.f32.mrf.mxu0  ;;  %v947_v20 = vpop.f32.mrf.mxu1 }
 0x1d0   :  { %v946_v18 = vadd.f32 %v945_v16, %v875_v28  ;;  %v877_v19 = vadd.f32 %v876_v17, %v780_v15 }
 0x1d2   :  { %1374 = vst [vmem:[#allocation2] sm:$0xff] %v946_v18  ;;  %v948_v29 = vadd.f32 %v947_v20, %v877_v19 }
 0x1d4   :  { %1375 = vst [vmem:[#allocation2 + $0x8] sm:$0xff] %v948_v29 }
 0x20e   :  { %v1016_v6 = vpop.f32.mrf.mxu0  ;;  %v1087_v22 = vpop.f32.mrf.mxu1 }
 0x20f   :  { %v1017_v23 = vadd.f32 %v1016_v6, %v784_v30 }
 0x210   :  { %v1018_v9 = vpop.f32.mrf.mxu0  ;;  %v1089_v26 = vpop.f32.mrf.mxu1 }
 0x211   :  { %v1088_v24 = vadd.f32 %v1087_v22, %v1017_v23  ;;  %v1019_v25 = vadd.f32 %v1018_v9, %v788_v21 }
 0x213   :  { %1376 = vst [vmem:[#allocation2 + $0x10] sm:$0xff] %v1088_v24  ;;  %v1090_v31 = vadd.f32 %v1089_v26, %v1019_v25 }
 0x215   :  { %1377 = vst [vmem:[#allocation2 + $0x18] sm:$0xff] %v1090_v31 }
 0x250   :  { %v1158_v7 = vpop.f32.mrf.mxu0  ;;  %v1229_v36 = vpop.f32.mrf.mxu1 }
 0x251   :  { %v1159_v37 = vadd.f32 %v1158_v7, %v792_v34 }
 0x252   :  { %v1160_v10 = vpop.f32.mrf.mxu0  ;;  %v1231_v40 = vpop.f32.mrf.mxu1 }
 0x253   :  { %v1230_v38 = vadd.f32 %v1229_v36, %v1159_v37  ;;  %v1161_v39 = vadd.f32 %v1160_v10, %v796_v35 }
 0x255   :  { %1378 = vst [vmem:[#allocation2 + $0x20] sm:$0xff] %v1230_v38  ;;  %v1232_v41 = vadd.f32 %v1231_v40, %v1161_v39 }
 0x257   :  { %1379 = vst [vmem:[#allocation2 + $0x28] sm:$0xff] %v1232_v41 }
 0x272   :  { %v1427_v43 = vpop.f32.mrf.mxu0  ;;  %v1462_v44 = vpop.f32.mrf.mxu1 }
 0x274   :  { %v1428_v46 = vpop.f32.mrf.mxu0  ;;  %v1463_v47 = vpop.f32.mrf.mxu1 }
 0x275   :  { %v1429_v48 = vadd.f32 %v1428_v46, %v1427_v43  ;;  %v1464_v50 = vadd.f32 %v1463_v47, %v1462_v44 }
 0x277   :  { %v1301_v49 = vadd.f32 %v1429_v48, %v800_v45 }
 0x279   :  { %v1371_v51 = vadd.f32 %v1464_v50, %v1301_v49 }
 0x27b   :  { %1380 = vst [vmem:[#allocation2 + $0x30] sm:$0xff] %v1371_v51 }
 0x27c   :  { %1477 = shalt.err (!%p1474_p4)
}
 0x27d   :  { %1390 = dma.vmem_to_hbm [thread:$0]  %s1388_s4, 896, %s3316_s5, [#allocation3]  }
 0x27e   :  { %1486 = dma.done.wait [#allocation3], 896  }
 0x27f   :  { %1487 = vsyncadd [#allocation3], 4294966400 }
 0x280   :  { %1394 = vsyncpa [#allocation3], 1 }

</bundles_post_ra>
